<compile_context>
chip_gen: v7x
topology: tpu7x:2x2x1
jax: 0.10.0
libtpu: 0.0.40
codegen_flags: <defaults>
</compile_context>

<pallas_src>
import jax
import jax.numpy as jnp
from jax.experimental import pallas as pl
from jax.experimental.pallas import tpu as pltpu

HIDDEN = 768          # fc1 input width (checked, as in the PyTorch module)
FC1_OUT = 512
NUM_CLASSES = 2
CLASSES_PAD = 8       # classes padded 2 -> 8 on the sublane axis


def _bert_head_kernel(x_ref, w1_ref, b1_ref, w2t_ref, b2t_ref, o_ref):
    """One grid step = `bt` batch rows.

    x_ref  : [bt, S, 768]   bf16  encoder activations
    w1_ref : [768, 512]     bf16  fc1 weight (input-major), VMEM resident
    b1_ref : [1, 512]       f32
    w2t_ref: [8, 512]       bf16  fc2 weight, transposed & class-padded 2->8
    b2t_ref: [8, 1]         f32
    o_ref  : [bt, 8, S]     f32   log-softmax over the sequence axis
    """
    bt, S, _ = x_ref.shape

    # fc1 over all bt*S rows at once (leading-dim merge is free: S is a
    # multiple of the bf16 sublane tile).  bf16 MXU inputs, f32 accumulate,
    # f32 elementwise math (v5e-safe).
    x = x_ref[...].reshape(bt * S, HIDDEN)                        # [bt*S, 768]
    h = jnp.dot(x, w1_ref[...], preferred_element_type=jnp.float32)
    h = jnp.maximum(h + b1_ref[...], 0.0)                         # [bt*S, 512] f32

    # Dropout(p=0.1): identity in eval/inference mode (matches PyTorch eval).
    # TODO(synk): training-mode dropout via pltpu.prng_seed + prng_random_bits
    # is not implemented for this forward pass.

    h = h.astype(jnp.bfloat16)

    # fc2 emitted directly in [classes, seq] orientation: w2t [8, 512] is
    # contracted against each batch row's [S, 512] hidden, so the long S axis
    # stays on the 128-lane MXU N dimension and the store is lane-dense
    # without a 128-wide class padding or a post-matmul transpose.
    for bi in range(bt):
        h_b = h[bi * S:(bi + 1) * S]                              # [S, 512] bf16
        lg = jax.lax.dot_general(
            w2t_ref[...], h_b,
            dimension_numbers=(((1,), (1,)), ((), ())),
            preferred_element_type=jnp.float32)                   # [8, S] f32
        lg = lg + b2t_ref[...]

        # LogSoftmax over dim=1 of the [B, S, 2] result == the sequence axis,
        # which is the lane axis here.  Each (padded) class row is normalized
        # independently, so the zero-padded rows never touch the real ones.
        m = jnp.max(lg, axis=1, keepdims=True)                    # [8, 1]
        z = lg - m
        lse = jnp.log(jnp.sum(jnp.exp(z), axis=1, keepdims=True))
        o_ref[bi] = z - lse


def bert_head_pallas(hidden, w1, b1, w2, b2, *, block_b=None):
    """Fused classifier head.

    hidden: [B, S, 768] float   (the encoder's last_hidden_state)
    w1: [768, 512], b1: [512], w2: [512, 2], b2: [2]   (input-major weights)
    returns: [B, S, 2] float32 log-probabilities (LogSoftmax over dim=1).
    """
    if hidden.ndim != 3 or hidden.shape[2] != HIDDEN:
        raise ValueError('Invalid input shape for fc1 layer.')
    B, S, _ = hidden.shape

    if block_b is None:
        # Keep >= 2 grid steps when possible (so dimension_semantics=parallel
        # actually splits across v7x's two TensorCores) and cap at 8 batch
        # rows/step for v7x's 64 MiB VMEM.  On v5e/v6e (128 MiB) callers can
        # pass block_b=16..32 for even better step-overhead amortization.
        block_b = max(1, min(8, pl.cdiv(B, 2))) if B > 1 else 1
    block_b = min(block_b, B)
    grid_b = pl.cdiv(B, block_b)

    # bf16 into the MXU; biases / accumulation stay f32.
    x = hidden.astype(jnp.bfloat16)
    w1b = w1.astype(jnp.bfloat16)
    b1r = b1.astype(jnp.float32).reshape(1, FC1_OUT)
    # fc2 weight transposed to [classes, 512] and class-padded 2 -> 8 so the
    # kernel output is [bt, 8, S]: 16x less HBM writeback than a 128-wide
    # class padding, and the wrapper only touches a tiny [B, 2, S] slice.
    w2t = jnp.zeros((CLASSES_PAD, FC1_OUT), jnp.bfloat16)
    w2t = w2t.at[:NUM_CLASSES, :].set(w2.astype(jnp.bfloat16).T)
    b2t = jnp.zeros((CLASSES_PAD, 1), jnp.float32)
    b2t = b2t.at[:NUM_CLASSES, 0].set(b2.astype(jnp.float32))

    grid_spec = pltpu.PrefetchScalarGridSpec(
        num_scalar_prefetch=0,
        grid=(grid_b,),
        in_specs=[
            pl.BlockSpec((block_b, S, HIDDEN), lambda b: (b, 0, 0)),      # acts
            pl.BlockSpec((HIDDEN, FC1_OUT), lambda b: (0, 0)),            # W1 (resident)
            pl.BlockSpec((1, FC1_OUT), lambda b: (0, 0)),                 # b1 (resident)
            pl.BlockSpec((CLASSES_PAD, FC1_OUT), lambda b: (0, 0)),       # W2^T (resident)
            pl.BlockSpec((CLASSES_PAD, 1), lambda b: (0, 0)),             # b2 (resident)
        ],
        out_specs=pl.BlockSpec((block_b, CLASSES_PAD, S), lambda b: (b, 0, 0)),
    )

    out_padded = pl.pallas_call(
        _bert_head_kernel,
        out_shape=jax.ShapeDtypeStruct((B, CLASSES_PAD, S), jnp.float32),
        grid_spec=grid_spec,
        compiler_params=pltpu.CompilerParams(
            dimension_semantics=("parallel",),   # batch blocks split across TCs on v7x
            # Footprint at block_b=8, S=128 is ~8 MiB (x 2x1.5 MiB, weights
            # ~1.6 MiB, h ~2 MiB, out 2x32 KiB) — 32 MiB is safe headroom on
            # v5e/v6e/v7x alike.
            vmem_limit_bytes=32 * 1024 * 1024,
        ),
    )(x, w1b, b1r, w2t, b2t)

    # [B, 8, S] -> keep the 2 real class rows -> [B, S, 2].  Each class row is
    # normalized over the sequence axis independently, so padding never
    # contaminates the real classes.
    return jnp.transpose(out_padded[:, :NUM_CLASSES, :], (0, 2, 1))


def synthetic_encoder(sent_id, mask, embed_table):
    # TODO(synk): pretrained bert-base-uncased encoder is not reproducible
    # in-script; a deterministic embedding lookup stands in for
    # bert(sent_id, attention_mask=mask)['last_hidden_state'] ([B, S, 768]).
    hidden = embed_table[sent_id]                                 # [B, S, 768]
    return hidden * mask[..., None].astype(hidden.dtype)


if __name__ == "__main__":
    B, S, VOCAB = 2, 128, 64
    key = jax.random.PRNGKey(0)
    k_emb, k_ids, k_w1, k_b1, k_w2, k_b2 = jax.random.split(key, 6)

    sent_id = jax.random.randint(k_ids, (B, S), 0, VOCAB, dtype=jnp.int32)
    mask = jnp.ones((B, S), jnp.int32)
    embed_table = jax.random.normal(k_emb, (VOCAB, HIDDEN), jnp.float32) * 0.05

    # fc weights stored input-major ([in, out] = transpose of nn.Linear).
    w1 = jax.random.normal(k_w1, (HIDDEN, FC1_OUT), jnp.float32) * 0.03
    b1 = jax.random.normal(k_b1, (FC1_OUT,), jnp.float32) * 0.01
    w2 = jax.random.normal(k_w2, (FC1_OUT, NUM_CLASSES), jnp.float32) * 0.03
    b2 = jax.random.normal(k_b2, (NUM_CLASSES,), jnp.float32) * 0.01

    hidden = synthetic_encoder(sent_id, mask, embed_table)

    out = jax.jit(bert_head_pallas)(hidden, w1, b1, w2, b2)
    out = jax.block_until_ready(out)
    assert out.shape == (B, S, NUM_CLASSES)

    # Pure-JAX reference with identical bf16 matmul precision.
    def ref_head(hidden, w1, b1, w2, b2):
        h = jnp.dot(hidden.astype(jnp.bfloat16), w1.astype(jnp.bfloat16),
                    preferred_element_type=jnp.float32) + b1
        h = jnp.maximum(h, 0.0)
        logits = jnp.dot(h.astype(jnp.bfloat16), w2.astype(jnp.bfloat16),
                         preferred_element_type=jnp.float32) + b2
        return jax.nn.log_softmax(logits, axis=1)   # dim=1 == sequence axis

    expect = ref_head(hidden, w1, b1, w2, b2)
    if not jnp.allclose(out, expect, atol=2e-2, rtol=2e-2):
        max_err = float(jnp.max(jnp.abs(out - expect)))
        raise AssertionError(f"mismatch vs reference, max abs err = {max_err}")

    print("KERNEL_OK")
</pallas_src>

<mosaic_0001>
module attributes {stable_mosaic.version = 11 : i64} {
  func.func @_bert_head_kernel(%arg0: i32, %arg1: memref<1x128x768xbf16, #tpu.memory_space<vmem>>, %arg2: memref<768x512xbf16, #tpu.memory_space<vmem>>, %arg3: memref<1x512xf32, #tpu.memory_space<vmem>>, %arg4: memref<8x512xbf16, #tpu.memory_space<vmem>>, %arg5: memref<8x1xf32, #tpu.memory_space<vmem>>, %arg6: memref<1x8x128xf32, #tpu.memory_space<vmem>>) attributes {dimension_semantics = [#tpu.dimension_semantics<parallel>], iteration_bounds = array<i64: 2>, scalar_prefetch = 0 : i64, scratch_operands = 0 : i64, tpu.core_type = #tpu.core_type<tc>, window_params = [{transform_indices = @transform_0, window_bounds = array<i64: 1, 128, 768>}, {pipeline_mode = #tpu.pipeline_mode<synchronous>, transform_indices = @transform_1, window_bounds = array<i64: 768, 512>}, {pipeline_mode = #tpu.pipeline_mode<synchronous>, transform_indices = @transform_2, window_bounds = array<i64: 1, 512>}, {pipeline_mode = #tpu.pipeline_mode<synchronous>, transform_indices = @transform_3, window_bounds = array<i64: 8, 512>}, {pipeline_mode = #tpu.pipeline_mode<synchronous>, transform_indices = @transform_4, window_bounds = array<i64: 8, 1>}, {transform_indices = @transform_5, window_bounds = array<i64: 1, 8, 128>}]} {
    %c0 = arith.constant 0 : index
    %c0_0 = arith.constant 0 : index
    %c0_1 = arith.constant 0 : index
    %0 = vector.load %arg1[%c0, %c0_0, %c0_1] : memref<1x128x768xbf16, #tpu.memory_space<vmem>>, vector<1x128x768xbf16>
    %1 = vector.shape_cast %0 : vector<1x128x768xbf16> to vector<128x768xbf16>
    %c0_2 = arith.constant 0 : index
    %c0_3 = arith.constant 0 : index
    %2 = vector.load %arg2[%c0_2, %c0_3] : memref<768x512xbf16, #tpu.memory_space<vmem>>, vector<768x512xbf16>
    %cst = arith.constant dense<0.000000e+00> : vector<128x512xf32>
    %3 = tpu.matmul %1, %2, %cst {dimension_numbers = #tpu.dot_dimension_numbers<[1], [0], [0], [1], [0, 0, 1, 1], [], []>} : vector<128x768xbf16>, vector<768x512xbf16>, vector<128x512xf32> -> vector<128x512xf32>
    %c0_4 = arith.constant 0 : index
    %c0_5 = arith.constant 0 : index
    %4 = vector.load %arg3[%c0_4, %c0_5] : memref<1x512xf32, #tpu.memory_space<vmem>>, vector<1x512xf32>
    %5 = vector.broadcast %4 : vector<1x512xf32> to vector<128x512xf32>
    %6 = arith.addf %3, %5 : vector<128x512xf32>
    %cst_6 = arith.constant 0.000000e+00 : f32
    %7 = vector.broadcast %cst_6 : f32 to vector<128x512xf32>
    %8 = arith.maximumf %6, %7 : vector<128x512xf32>
    %9 = arith.truncf %8 : vector<128x512xf32> to vector<128x512xbf16>
    %c0_7 = arith.constant 0 : index
    %c0_8 = arith.constant 0 : index
    %10 = vector.load %arg4[%c0_7, %c0_8] : memref<8x512xbf16, #tpu.memory_space<vmem>>, vector<8x512xbf16>
    %cst_9 = arith.constant dense<0.000000e+00> : vector<8x128xf32>
    %11 = tpu.matmul %10, %9, %cst_9 {dimension_numbers = #tpu.dot_dimension_numbers<[1], [1], [0], [0], [0, 0, 1, 0], [], []>} : vector<8x512xbf16>, vector<128x512xbf16>, vector<8x128xf32> -> vector<8x128xf32>
    %c0_10 = arith.constant 0 : index
    %c0_11 = arith.constant 0 : index
    %12 = vector.load %arg5[%c0_10, %c0_11] : memref<8x1xf32, #tpu.memory_space<vmem>>, vector<8x1xf32>
    %13 = vector.broadcast %12 : vector<8x1xf32> to vector<8x128xf32>
    %14 = arith.addf %11, %13 : vector<8x128xf32>
    %cst_12 = arith.constant dense<0xFF800000> : vector<8xf32>
    %15 = vector.multi_reduction <maximumf>, %14, %cst_12 [1] : vector<8x128xf32> to vector<8xf32>
    %16 = vector.shape_cast %15 : vector<8xf32> to vector<8x1xf32>
    %17 = vector.broadcast %16 : vector<8x1xf32> to vector<8x128xf32>
    %18 = arith.subf %14, %17 : vector<8x128xf32>
    %19 = math.exp %18 : vector<8x128xf32>
    %cst_13 = arith.constant dense<0.000000e+00> : vector<8xf32>
    %20 = vector.multi_reduction <add>, %19, %cst_13 [1] : vector<8x128xf32> to vector<8xf32>
    %21 = vector.shape_cast %20 : vector<8xf32> to vector<8x1xf32>
    %22 = math.log %21 : vector<8x1xf32>
    %23 = vector.broadcast %22 : vector<8x1xf32> to vector<8x128xf32>
    %24 = arith.subf %18, %23 : vector<8x128xf32>
    %c0_14 = arith.constant 0 : index
    %c0_15 = arith.constant 0 : index
    %c0_16 = arith.constant 0 : index
    %25 = vector.load %arg6[%c0_14, %c0_15, %c0_16] : memref<1x8x128xf32, #tpu.memory_space<vmem>>, vector<1x8x128xf32>
    %26 = vector.shape_cast %25 : vector<1x8x128xf32> to vector<8x128xf32>
    %27 = vector.shape_cast %24 : vector<8x128xf32> to vector<1x8x128xf32>
    tpu.vector_store %arg6[%c0_14, %c0_15, %c0_16], %27 {strides = array<i32>} : memref<1x8x128xf32, #tpu.memory_space<vmem>>, vector<1x8x128xf32>,
    return
  }
  func.func @transform_0(%arg0: i32) -> (i32, i32, i32) {
    %c0_i32 = arith.constant 0 : i32
    %c0_i32_0 = arith.constant 0 : i32
    %c0_i32_1 = arith.constant 0 : i32
    return %arg0, %c0_i32, %c0_i32_0 : i32, i32, i32
  }
  func.func @transform_1(%arg0: i32) -> (i32, i32) {
    %c0_i32 = arith.constant 0 : i32
    %c0_i32_0 = arith.constant 0 : i32
    %c0_i32_1 = arith.constant 0 : i32
    return %c0_i32, %c0_i32_0 : i32, i32
  }
  func.func @transform_2(%arg0: i32) -> (i32, i32) {
    %c0_i32 = arith.constant 0 : i32
    %c0_i32_0 = arith.constant 0 : i32
    %c0_i32_1 = arith.constant 0 : i32
    return %c0_i32, %c0_i32_0 : i32, i32
  }
  func.func @transform_3(%arg0: i32) -> (i32, i32) {
    %c0_i32 = arith.constant 0 : i32
    %c0_i32_0 = arith.constant 0 : i32
    %c0_i32_1 = arith.constant 0 : i32
    return %c0_i32, %c0_i32_0 : i32, i32
  }
  func.func @transform_4(%arg0: i32) -> (i32, i32) {
    %c0_i32 = arith.constant 0 : i32
    %c0_i32_0 = arith.constant 0 : i32
    %c0_i32_1 = arith.constant 0 : i32
    return %c0_i32, %c0_i32_0 : i32, i32
  }
  func.func @transform_5(%arg0: i32) -> (i32, i32, i32) {
    %c0_i32 = arith.constant 0 : i32
    %c0_i32_0 = arith.constant 0 : i32
    %c0_i32_1 = arith.constant 0 : i32
    return %arg0, %c0_i32, %c0_i32_0 : i32, i32, i32
  }
}

</mosaic_0001>

<bundles_post_ra>
// kernel: bert_head_pallas.1
= control target key start
LH: loop header
LB: loop body
LE: loop exit
PB: predicated region body
PF: predicated region fallthrough
CT: control target
= control target key end

     0   :  { %s3491_s18 = smov 0   ;;  %s4238_s0 = inlined_call_operand.vmem [shape: bf16[2,128,768], index: 0, kind: input, shape index: {}]   ;;  %s4239_s1 = inlined_call_operand.vmem [shape: bf16[768,512], index: 1, kind: input, shape index: {}]   ;;  %s4240_s2 = inlined_call_operand.vmem [shape: f32[1,512], index: 2, kind: input, shape index: {}]   ;;  %s4241_s3 = inlined_call_operand.vmem [shape: bf16[8,512], index: 3, kind: input, shape index: {}]   ;;  %s4242_s4 = inlined_call_operand.vmem [shape: f32[8,1], index: 4, kind: input, shape index: {}]   ;;  %s4243_s5 = inlined_call_operand.vmem [shape: f32[2,8,128], index: 5, kind: output, shape index: {}]  }
   0x1 LB: > { %s2626_s19 = sadd.s32 4294967295, %s3458_s18   ;;  %p2630_p0 = scmp.ge.s32.totalorder %s3458_s18, 1  ;;  %s3458_s18 = sphi %s3491_s18, %s15_s18  }
   0x2   : > { %p187_p1 = scmp.lt.s32.totalorder %s3458_s18, 3 }
   0x4   : > { %p188_p2 = pnand %p2630_p0, %p187_p1 }
   0x5   : > { %v3084_v0 = vld [vmem:[%s4239_s1 + $0x4] ss:$16 sps:$4 sm:$0xff] (!%p188_p2)   ;;  %v3086_v1 = vld [vmem:[%s4239_s1 + $0xc] ss:$16 sps:$4 sm:$0xff] (!%p188_p2)   ;;  %v3088_v2 = vld [vmem:[%s4239_s1] ss:$16 sps:$4 sm:$0xff] (!%p188_p2)  }
   0x6   : > { %191 = sbr.rel (%p188_p2) target bundleno = 1014 (0x3f6), region = 40  ;;  %1686 = vmatprep.subr.bf16.mxu0 (!%p188_p2), %v3084_v0  ;;  %v3089_v3 = vld [vmem:[%s4239_s1 + $0x8] ss:$16 sps:$4 sm:$0xff] (!%p188_p2)   ;;  %2025 = vmatprep.subr.bf16.mxu1 (!%p188_p2), %v3086_v1  ;;  %v3090_v4 = vld [vmem:[%s4239_s1 + $0x24] ss:$16 sps:$4 sm:$0xff] (!%p188_p2)   ;;  %p214_p3 = scmp.lt.s32.totalorder (!%p188_p2), %s2626_s19, 1 }
   0x7   : > { %1687 = vmatpush1.bf16.msra.mxu0 (!%p188_p2), %v3088_v2  ;;  %2026 = vmatpush1.bf16.msra.mxu1 (!%p188_p2), %v3089_v3  ;;  %v3092_v5 = vld [vmem:[%s4239_s1 + $0x2c] ss:$16 sps:$4 sm:$0xff] (!%p188_p2)   ;;  %v3094_v6 = vld [vmem:[%s4239_s1 + $0x20] ss:$16 sps:$4 sm:$0xff] (!%p188_p2)   ;;  %v3095_v7 = vld [vmem:[%s4239_s1 + $0x28] ss:$16 sps:$4 sm:$0xff] (!%p188_p2)  }
   0x8   : > { %1688 = vmatprep.subr.bf16.mxu0 (!%p188_p2), %v3090_v4  ;;  %2027 = vmatprep.subr.bf16.mxu1 (!%p188_p2), %v3092_v5  ;;  %v3096_v8 = vld [vmem:[%s4239_s1 + $0x44] ss:$16 sps:$4 sm:$0xff] (!%p188_p2)   ;;  %v3098_v9 = vld [vmem:[%s4239_s1 + $0x4c] ss:$16 sps:$4 sm:$0xff] (!%p188_p2)   ;;  %v3100_v10 = vld [vmem:[%s4239_s1 + $0x40] ss:$16 sps:$4 sm:$0xff] (!%p188_p2)  }
   0x9   : > { %v3101_v11 = vld [vmem:[%s4239_s1 + $0x48] ss:$16 sps:$4 sm:$0xff] (!%p188_p2)   ;;  %v3102_v12 = vld [vmem:[%s4239_s1 + $0x64] ss:$16 sps:$4 sm:$0xff] (!%p188_p2)   ;;  %v3104_v13 = vld [vmem:[%s4239_s1 + $0x6c] ss:$16 sps:$4 sm:$0xff] (!%p188_p2)  }
   0xa   : > { %v3106_v14 = vld [vmem:[%s4239_s1 + $0x60] ss:$16 sps:$4 sm:$0xff] (!%p188_p2)   ;;  %v3107_v15 = vld [vmem:[%s4239_s1 + $0x68] ss:$16 sps:$4 sm:$0xff] (!%p188_p2)   ;;  %v3108_v16 = vld [vmem:[%s4239_s1 + $0x84] ss:$16 sps:$4 sm:$0xff] (!%p188_p2)  }
   0xb   : > { %1689 = vmatpush1.bf16.msra.mxu0 (!%p188_p2), %v3094_v6  ;;  %2028 = vmatpush1.bf16.msra.mxu1 (!%p188_p2), %v3095_v7  ;;  %v3110_v17 = vld [vmem:[%s4239_s1 + $0x8c] ss:$16 sps:$4 sm:$0xff] (!%p188_p2)   ;;  %v3112_v18 = vld [vmem:[%s4239_s1 + $0x80] ss:$16 sps:$4 sm:$0xff] (!%p188_p2)   ;;  %v3113_v19 = vld [vmem:[%s4239_s1 + $0x88] ss:$16 sps:$4 sm:$0xff] (!%p188_p2)  }
   0xc   : > { %1690 = vmatprep.subr.bf16.mxu0 (!%p188_p2), %v3096_v8  ;;  %2029 = vmatprep.subr.bf16.mxu1 (!%p188_p2), %v3098_v9  ;;  %v3114_v20 = vld [vmem:[%s4239_s1 + $0xa4] ss:$16 sps:$4 sm:$0xff] (!%p188_p2)   ;;  %v3116_v21 = vld [vmem:[%s4239_s1 + $0xac] ss:$16 sps:$4 sm:$0xff] (!%p188_p2)   ;;  %v3118_v22 = vld [vmem:[%s4239_s1 + $0xa0] ss:$16 sps:$4 sm:$0xff] (!%p188_p2)  }
   0xd   : > { %v3119_v23 = vld [vmem:[%s4239_s1 + $0xa8] ss:$16 sps:$4 sm:$0xff]   ;;  %v3120_v24 = vld [vmem:[%s4239_s1 + $0xc4] ss:$16 sps:$4 sm:$0xff]   ;;  %v3122_v25 = vld [vmem:[%s4239_s1 + $0xcc] ss:$16 sps:$4 sm:$0xff]  }
   0xe   : > { %v3124_v26 = vld [vmem:[%s4239_s1 + $0xc0] ss:$16 sps:$4 sm:$0xff]   ;;  %v3125_v27 = vld [vmem:[%s4239_s1 + $0xc8] ss:$16 sps:$4 sm:$0xff]   ;;  %v3126_v28 = vld [vmem:[%s4239_s1 + $0xe4] ss:$16 sps:$4 sm:$0xff]  }
   0xf   : > { %1691 = vmatpush1.bf16.msra.mxu0 %v3100_v10  ;;  %2030 = vmatpush1.bf16.msra.mxu1 %v3101_v11  ;;  %v3128_v29 = vld [vmem:[%s4239_s1 + $0xec] ss:$16 sps:$4 sm:$0xff]   ;;  %v3130_v30 = vld [vmem:[%s4239_s1 + $0xe0] ss:$16 sps:$4 sm:$0xff]   ;;  %v3131_v31 = vld [vmem:[%s4239_s1 + $0xe8] ss:$16 sps:$4 sm:$0xff]  }
  0x10   : > { %1692 = vmatprep.subr.bf16.mxu0 %v3102_v12  ;;  %2031 = vmatprep.subr.bf16.mxu1 %v3104_v13  ;;  %v3132_v32 = vld [vmem:[%s4239_s1 + $0x104] ss:$16 sps:$4 sm:$0xff]   ;;  %v3134_v33 = vld [vmem:[%s4239_s1 + $0x10c] ss:$16 sps:$4 sm:$0xff]   ;;  %v3136_v34 = vld [vmem:[%s4239_s1 + $0x100] ss:$16 sps:$4 sm:$0xff]  }
  0x11   : > { %v3137_v35 = vld [vmem:[%s4239_s1 + $0x108] ss:$16 sps:$4 sm:$0xff]   ;;  %v3138_v36 = vld [vmem:[%s4239_s1 + $0x124] ss:$16 sps:$4 sm:$0xff]   ;;  %s4245_s19 = smov (!%p214_p3, %s2626_s19), 1 }
  0x12   : > { %v3140_v37 = vld [vmem:[%s4239_s1 + $0x12c] ss:$16 sps:$4 sm:$0xff]   ;;  %v3142_v38 = vld [vmem:[%s4239_s1 + $0x120] ss:$16 sps:$4 sm:$0xff]   ;;  %v3143_v39 = vld [vmem:[%s4239_s1 + $0x128] ss:$16 sps:$4 sm:$0xff]  }
  0x13   : > { %1693 = vmatpush1.bf16.msra.mxu0 %v3106_v14  ;;  %2032 = vmatpush1.bf16.msra.mxu1 %v3107_v15  ;;  %v3144_v40 = vld [vmem:[%s4239_s1 + $0x144] ss:$16 sps:$4 sm:$0xff]   ;;  %s3073_s8 = smul.u32 384, %s4245_s19  ;;  %v3146_v41 = vld [vmem:[%s4239_s1 + $0x14c] ss:$16 sps:$4 sm:$0xff]   ;;  %s2632_s12 = sshll.u32 %s4245_s19, 3 }
  0x14   : > { %1694 = vmatprep.subr.bf16.mxu0 %v3108_v16  ;;  %2033 = vmatprep.subr.bf16.mxu1 %v3110_v17  ;;  %v3148_v42 = vld [vmem:[%s4239_s1 + $0x140] ss:$16 sps:$4 sm:$0xff]   ;;  %v3149_v43 = vld [vmem:[%s4239_s1 + $0x148] ss:$16 sps:$4 sm:$0xff]   ;;  %v3150_v44 = vld [vmem:[%s4239_s1 + $0x164] ss:$16 sps:$4 sm:$0xff]   ;;  %s222_s15 = scalar_lea.vmem %s4243_s5, %s2632_s12 }
  0x15   : > { %s3644_s21 = scalar_lea.vmem %s4238_s0, %s3073_s8  ;;  %v3152_v45 = vld [vmem:[%s4239_s1 + $0x16c] ss:$16 sps:$4 sm:$0xff]   ;;  %v3154_v46 = vld [vmem:[%s4239_s1 + $0x160] ss:$16 sps:$4 sm:$0xff]   ;;  %v3155_v47 = vld [vmem:[%s4239_s1 + $0x168] ss:$16 sps:$4 sm:$0xff]  }
  0x16   : > { %v3182_v48 = vld [vmem:[%s3644_s21 + $0x4] ss:$24 sps:$4 sm:$0xff]   ;;  %v3160_v51 = vld [vmem:[%s4239_s1 + $0x180] ss:$16 sps:$4 sm:$0xff]   ;;  %v3161_v52 = vld [vmem:[%s4239_s1 + $0x188] ss:$16 sps:$4 sm:$0xff]  }
  0x17   : > { %1695 = vmatpush1.bf16.msra.mxu0 %v3112_v18  ;;  %2034 = vmatpush1.bf16.msra.mxu1 %v3113_v19  ;;  %v3156_v49 = vld [vmem:[%s4239_s1 + $0x184] ss:$16 sps:$4 sm:$0xff]   ;;  %v3158_v50 = vld [vmem:[%s4239_s1 + $0x18c] ss:$16 sps:$4 sm:$0xff]   ;;  %v3166_v55 = vld [vmem:[%s4239_s1 + $0x1a0] ss:$16 sps:$4 sm:$0xff]  }
  0x18   : > { %1696 = vmatprep.subr.bf16.mxu0 %v3114_v20  ;;  %2035 = vmatprep.subr.bf16.mxu1 %v3116_v21  ;;  %v3162_v53 = vld [vmem:[%s4239_s1 + $0x1a4] ss:$16 sps:$4 sm:$0xff]   ;;  %v3164_v54 = vld [vmem:[%s4239_s1 + $0x1ac] ss:$16 sps:$4 sm:$0xff]   ;;  %v3167_v56 = vld [vmem:[%s4239_s1 + $0x1a8] ss:$16 sps:$4 sm:$0xff]  }
  0x19   : > { %1718 = vmatprep.mubr.bf16.mxu0 %v3182_v48  ;;  %2057 = vmatprep.mubr.bf16.mxu1 %v3182_v48  ;;  %v3168_v57 = vld [vmem:[%s4239_s1 + $0x1c4] ss:$16 sps:$4 sm:$0xff]   ;;  %v3170_v58 = vld [vmem:[%s4239_s1 + $0x1cc] ss:$16 sps:$4 sm:$0xff]   ;;  %v3172_v59 = vld [vmem:[%s4239_s1 + $0x1c0] ss:$16 sps:$4 sm:$0xff]  }
  0x1a   : > { %v3173_v60 = vld [vmem:[%s4239_s1 + $0x1c8] ss:$16 sps:$4 sm:$0xff]   ;;  %v3174_v61 = vld [vmem:[%s4239_s1 + $0x1e4] ss:$16 sps:$4 sm:$0xff]   ;;  %v3176_v62 = vld [vmem:[%s4239_s1 + $0x1ec] ss:$16 sps:$4 sm:$0xff]  }
  0x1b   : > { %1697 = vmatpush1.bf16.msra.mxu0 %v3118_v22  ;;  %2036 = vmatpush1.bf16.msra.mxu1 %v3119_v23  ;;  %v3178_v63 = vld [vmem:[%s4239_s1 + $0x1e0] ss:$16 sps:$4 sm:$0xff]   ;;  %v3179_v0 = vld [vmem:[%s4239_s1 + $0x1e8] ss:$16 sps:$4 sm:$0xff]   ;;  %v3185_v1 = vld [vmem:[%s4239_s1 + $0x204] ss:$16 sps:$4 sm:$0xff]  }
  0x1c   : > { %1698 = vmatprep.subr.bf16.mxu0 %v3120_v24  ;;  %2037 = vmatprep.subr.bf16.mxu1 %v3122_v25  ;;  %v3188_v2 = vld [vmem:[%s4239_s1 + $0x20c] ss:$16 sps:$4 sm:$0xff]   ;;  %v3180_v3 = vld [vmem:[%s3644_s21] ss:$24 sps:$4 sm:$0xff]   ;;  %v3191_v6 = vld [vmem:[%s4239_s1 + $0x224] ss:$16 sps:$4 sm:$0xff]  }
  0x1d   : > { %v3183_v4 = vld [vmem:[%s4239_s1 + $0x200] ss:$16 sps:$4 sm:$0xff]   ;;  %v3186_v5 = vld [vmem:[%s4239_s1 + $0x208] ss:$16 sps:$4 sm:$0xff]   ;;  %v3194_v7 = vld [vmem:[%s4239_s1 + $0x22c] ss:$16 sps:$4 sm:$0xff]  }
  0x1e   : > { %v3195_v8 = vld [vmem:[%s3644_s21 + $0x34] ss:$24 sps:$4 sm:$0xff]   ;;  %v3189_v9 = vld [vmem:[%s4239_s1 + $0x220] ss:$16 sps:$4 sm:$0xff]   ;;  %v3192_v10 = vld [vmem:[%s4239_s1 + $0x228] ss:$16 sps:$4 sm:$0xff]  }
  0x1f   : > { %1699 = vmatpush1.bf16.msra.mxu0 %v3124_v26  ;;  %2038 = vmatpush1.bf16.msra.mxu1 %v3125_v27  ;;  %v3200_v11 = vld [vmem:[%s4239_s1 + $0x244] ss:$16 sps:$4 sm:$0xff]   ;;  %v3203_v12 = vld [vmem:[%s4239_s1 + $0x24c] ss:$16 sps:$4 sm:$0xff]   ;;  %v3197_v13 = vld [vmem:[%s3644_s21 + $0x30] ss:$24 sps:$4 sm:$0xff]  }
  0x20   : > { %1700 = vmatprep.subr.bf16.mxu0 %v3126_v28  ;;  %2039 = vmatprep.subr.bf16.mxu1 %v3128_v29  ;;  %v3198_v14 = vld [vmem:[%s4239_s1 + $0x240] ss:$16 sps:$4 sm:$0xff]   ;;  %v3201_v15 = vld [vmem:[%s4239_s1 + $0x248] ss:$16 sps:$4 sm:$0xff]   ;;  %v3206_v16 = vld [vmem:[%s4239_s1 + $0x264] ss:$16 sps:$4 sm:$0xff]  }
  0x21   : > { %v3209_v17 = vld [vmem:[%s4239_s1 + $0x26c] ss:$16 sps:$4 sm:$0xff]   ;;  %v3204_v19 = vld [vmem:[%s4239_s1 + $0x260] ss:$16 sps:$4 sm:$0xff]   ;;  %v3207_v20 = vld [vmem:[%s4239_s1 + $0x268] ss:$16 sps:$4 sm:$0xff]  }
  0x22   : > { %v3210_v18 = vld [vmem:[%s3644_s21 + $0x64] ss:$24 sps:$4 sm:$0xff]   ;;  %v3212_v23 = vld [vmem:[%s3644_s21 + $0x60] ss:$24 sps:$4 sm:$0xff]   ;;  %v3225_v28 = vld [vmem:[%s3644_s21 + $0x94] ss:$24 sps:$4 sm:$0xff]  }
  0x23   : > { %1701 = vmatpush1.bf16.msra.mxu0 %v3130_v30  ;;  %2040 = vmatpush1.bf16.msra.mxu1 %v3131_v31  ;;  %v3215_v21 = vld [vmem:[%s4239_s1 + $0x284] ss:$16 sps:$4 sm:$0xff]   ;;  %v3218_v22 = vld [vmem:[%s4239_s1 + $0x28c] ss:$16 sps:$4 sm:$0xff]   ;;  %v3213_v24 = vld [vmem:[%s4239_s1 + $0x280] ss:$16 sps:$4 sm:$0xff]  }
  0x24   : > { %1702 = vmatprep.subr.bf16.mxu0 %v3132_v32  ;;  %2041 = vmatprep.subr.bf16.mxu1 %v3134_v33  ;;  %v3216_v25 = vld [vmem:[%s4239_s1 + $0x288] ss:$16 sps:$4 sm:$0xff]   ;;  %v3221_v26 = vld [vmem:[%s4239_s1 + $0x2a4] ss:$16 sps:$4 sm:$0xff]   ;;  %v3224_v27 = vld [vmem:[%s4239_s1 + $0x2ac] ss:$16 sps:$4 sm:$0xff]  }
  0x25   : > { %v3219_v29 = vld [vmem:[%s4239_s1 + $0x2a0] ss:$16 sps:$4 sm:$0xff]   ;;  %v3222_v30 = vld [vmem:[%s4239_s1 + $0x2a8] ss:$16 sps:$4 sm:$0xff]   ;;  %v3230_v31 = vld [vmem:[%s4239_s1 + $0x2c4] ss:$16 sps:$4 sm:$0xff]  }
  0x26   : > { %v3233_v32 = vld [vmem:[%s4239_s1 + $0x2cc] ss:$16 sps:$4 sm:$0xff]   ;;  %v3227_v33 = vld [vmem:[%s3644_s21 + $0x90] ss:$24 sps:$4 sm:$0xff]  }
  0x27   : > { %1703 = vmatpush1.bf16.msra.mxu0 %v3136_v34  ;;  %2042 = vmatpush1.bf16.msra.mxu1 %v3137_v35  ;;  %v3228_v34 = vld [vmem:[%s4239_s1 + $0x2c0] ss:$16 sps:$4 sm:$0xff]   ;;  %v3231_v35 = vld [vmem:[%s4239_s1 + $0x2c8] ss:$16 sps:$4 sm:$0xff]   ;;  %v3255_v48 = vld [vmem:[%s3644_s21 + $0xf4] ss:$24 sps:$4 sm:$0xff]  }
  0x28   : > { %1704 = vmatprep.subr.bf16.mxu0 %v3138_v36  ;;  %2043 = vmatprep.subr.bf16.mxu1 %v3140_v37  ;;  %v3236_v36 = vld [vmem:[%s4239_s1 + $0x2e4] ss:$16 sps:$4 sm:$0xff]   ;;  %v3239_v37 = vld [vmem:[%s4239_s1 + $0x2ec] ss:$16 sps:$4 sm:$0xff]  }
  0x2b   : > { %1705 = vmatpush1.bf16.msra.mxu0 %v3142_v38  ;;  %2044 = vmatpush1.bf16.msra.mxu1 %v3143_v39  ;;  %v3240_v38 = vld [vmem:[%s3644_s21 + $0xc4] ss:$24 sps:$4 sm:$0xff]   ;;  %v3234_v39 = vld [vmem:[%s4239_s1 + $0x2e0] ss:$16 sps:$4 sm:$0xff]  }
  0x2c   : > { %1706 = vmatprep.subr.bf16.mxu0 %v3144_v40  ;;  %2045 = vmatprep.subr.bf16.mxu1 %v3146_v41  ;;  %v3237_v40 = vld [vmem:[%s4239_s1 + $0x2e8] ss:$16 sps:$4 sm:$0xff]   ;;  %v3245_v41 = vld [vmem:[%s4239_s1 + $0x304] ss:$16 sps:$4 sm:$0xff]  }
  0x2f   : > { %1707 = vmatpush1.bf16.msra.mxu0 %v3148_v42  ;;  %2046 = vmatpush1.bf16.msra.mxu1 %v3149_v43  ;;  %v3248_v42 = vld [vmem:[%s4239_s1 + $0x30c] ss:$16 sps:$4 sm:$0xff]   ;;  %v3242_v43 = vld [vmem:[%s3644_s21 + $0xc0] ss:$24 sps:$4 sm:$0xff]  }
  0x30   : > { %1708 = vmatprep.subr.bf16.mxu0 %v3150_v44  ;;  %2047 = vmatprep.subr.bf16.mxu1 %v3152_v45  ;;  %v3243_v44 = vld [vmem:[%s4239_s1 + $0x300] ss:$16 sps:$4 sm:$0xff]   ;;  %v3246_v45 = vld [vmem:[%s4239_s1 + $0x308] ss:$16 sps:$4 sm:$0xff]  }
  0x33   : > { %1709 = vmatpush1.bf16.msra.mxu0 %v3154_v46  ;;  %2048 = vmatpush1.bf16.msra.mxu1 %v3155_v47  ;;  %v3251_v46 = vld [vmem:[%s4239_s1 + $0x324] ss:$16 sps:$4 sm:$0xff]   ;;  %v3254_v47 = vld [vmem:[%s4239_s1 + $0x32c] ss:$16 sps:$4 sm:$0xff]  }
  0x34   : > { %1710 = vmatprep.subr.bf16.mxu0 %v3156_v49  ;;  %2049 = vmatprep.subr.bf16.mxu1 %v3158_v50  ;;  %v3249_v49 = vld [vmem:[%s4239_s1 + $0x320] ss:$16 sps:$4 sm:$0xff]   ;;  %v3252_v50 = vld [vmem:[%s4239_s1 + $0x328] ss:$16 sps:$4 sm:$0xff]  }
  0x37   : > { %1711 = vmatpush1.bf16.msra.mxu0 %v3160_v51  ;;  %2050 = vmatpush1.bf16.msra.mxu1 %v3161_v52  ;;  %v3260_v51 = vld [vmem:[%s4239_s1 + $0x344] ss:$16 sps:$4 sm:$0xff]   ;;  %v3263_v52 = vld [vmem:[%s4239_s1 + $0x34c] ss:$16 sps:$4 sm:$0xff]  }
  0x38   : > { %1712 = vmatprep.subr.bf16.mxu0 %v3162_v53  ;;  %2051 = vmatprep.subr.bf16.mxu1 %v3164_v54  ;;  %v3257_v53 = vld [vmem:[%s3644_s21 + $0xf0] ss:$24 sps:$4 sm:$0xff]  }
  0x39   : > { %v3258_v54 = vld [vmem:[%s4239_s1 + $0x340] ss:$16 sps:$4 sm:$0xff]  }
  0x3b   : > { %1713 = vmatpush1.bf16.msra.mxu0 %v3166_v55  ;;  %2052 = vmatpush1.bf16.msra.mxu1 %v3167_v56  ;;  %v3261_v55 = vld [vmem:[%s4239_s1 + $0x348] ss:$16 sps:$4 sm:$0xff]   ;;  %v3266_v56 = vld [vmem:[%s4239_s1 + $0x364] ss:$16 sps:$4 sm:$0xff]  }
  0x3c   : > { %1714 = vmatprep.subr.bf16.mxu0 %v3168_v57  ;;  %2053 = vmatprep.subr.bf16.mxu1 %v3170_v58  ;;  %v3269_v57 = vld [vmem:[%s4239_s1 + $0x36c] ss:$16 sps:$4 sm:$0xff]  }
  0x3d   : > { %v3270_v58 = vld [vmem:[%s3644_s21 + $0x124] ss:$24 sps:$4 sm:$0xff]  }
  0x3f   : > { %1715 = vmatpush1.bf16.msra.mxu0 %v3172_v59  ;;  %2054 = vmatpush1.bf16.msra.mxu1 %v3173_v60  ;;  %v3264_v59 = vld [vmem:[%s4239_s1 + $0x360] ss:$16 sps:$4 sm:$0xff]   ;;  %v3267_v60 = vld [vmem:[%s4239_s1 + $0x368] ss:$16 sps:$4 sm:$0xff]  }
  0x40   : > { %1716 = vmatprep.subr.bf16.mxu0 %v3174_v61  ;;  %2055 = vmatprep.subr.bf16.mxu1 %v3176_v62  ;;  %v3275_v61 = vld [vmem:[%s4239_s1 + $0x384] ss:$16 sps:$4 sm:$0xff]   ;;  %v3278_v62 = vld [vmem:[%s4239_s1 + $0x38c] ss:$16 sps:$4 sm:$0xff]  }
  0x43   : > { %1717 = vmatpush1.bf16.msra.mxu0 %v3178_v63  ;;  %2056 = vmatpush1.bf16.msra.mxu1 %v3179_v0  ;;  %v3272_v63 = vld [vmem:[%s3644_s21 + $0x120] ss:$24 sps:$4 sm:$0xff]  }
  0x44   : > { %1799 = vmatprep.subr.bf16.mxu0 %v3185_v1  ;;  %2138 = vmatprep.subr.bf16.mxu1 %v3188_v2  ;;  %v3273_v0 = vld [vmem:[%s4239_s1 + $0x380] ss:$16 sps:$4 sm:$0xff]   ;;  %v3276_v1 = vld [vmem:[%s4239_s1 + $0x388] ss:$16 sps:$4 sm:$0xff]   ;;  %v3281_v2 = vld [vmem:[%s4239_s1 + $0x3a4] ss:$16 sps:$4 sm:$0xff]  }
  0x46   : > { %1719 = vmatmul.mubr.bf16.vlgmr.msra.gmra.mrb[0].mxu0 %v3180_v3  ;;  %2058 = vmatmul.mubr.bf16.vlgmr.msra.gmra.mrb[0].mxu1 %v3180_v3  ;;  %v3284_v3 = vld [vmem:[%s4239_s1 + $0x3ac] ss:$16 sps:$4 sm:$0xff]  }
  0x47   : > { %1800 = vmatpush1.bf16.msra.mxu0 %v3183_v4  ;;  %2139 = vmatpush1.bf16.msra.mxu1 %v3186_v5  ;;  %v3285_v4 = vld [vmem:[%s3644_s21 + $0x154] ss:$24 sps:$4 sm:$0xff]   ;;  %v3279_v5 = vld [vmem:[%s4239_s1 + $0x3a0] ss:$16 sps:$4 sm:$0xff]  }
  0x48   : > { %1801 = vmatprep.subr.bf16.mxu0 %v3191_v6  ;;  %2140 = vmatprep.subr.bf16.mxu1 %v3194_v7  ;;  %v3282_v6 = vld [vmem:[%s4239_s1 + $0x3a8] ss:$16 sps:$4 sm:$0xff]   ;;  %v3290_v7 = vld [vmem:[%s4239_s1 + $0x3c4] ss:$16 sps:$4 sm:$0xff]  }
  0x49   : > { %1728 = vmatprep.mubr.bf16.mxu0 %v3195_v8  ;;  %2067 = vmatprep.mubr.bf16.mxu1 %v3195_v8  ;;  %v3293_v8 = vld [vmem:[%s4239_s1 + $0x3cc] ss:$16 sps:$4 sm:$0xff]  }
  0x4b   : > { %1802 = vmatpush1.bf16.msra.mxu0 %v3189_v9  ;;  %2141 = vmatpush1.bf16.msra.mxu1 %v3192_v10  ;;  %v3287_v9 = vld [vmem:[%s3644_s21 + $0x150] ss:$24 sps:$4 sm:$0xff]  }
  0x4c   : > { %1803 = vmatprep.subr.bf16.mxu0 %v3200_v11  ;;  %2142 = vmatprep.subr.bf16.mxu1 %v3203_v12  ;;  %v3288_v10 = vld [vmem:[%s4239_s1 + $0x3c0] ss:$16 sps:$4 sm:$0xff]   ;;  %v3291_v11 = vld [vmem:[%s4239_s1 + $0x3c8] ss:$16 sps:$4 sm:$0xff]   ;;  %v3296_v12 = vld [vmem:[%s4239_s1 + $0x3e4] ss:$16 sps:$4 sm:$0xff]  }
  0x4e   : > { %1729 = vmatmul.mubr.bf16.gmra.mrb[4].mxu0 %v3197_v13  ;;  %2068 = vmatmul.mubr.bf16.gmra.mrb[4].mxu1 %v3197_v13  ;;  %v3299_v13 = vld [vmem:[%s4239_s1 + $0x3ec] ss:$16 sps:$4 sm:$0xff]  }
  0x4f   : > { %1804 = vmatpush1.bf16.msra.mxu0 %v3198_v14  ;;  %2143 = vmatpush1.bf16.msra.mxu1 %v3201_v15  ;;  %v3302_v14 = vld [vmem:[%s3644_s21 + $0xc] ss:$24 sps:$4 sm:$0xff]   ;;  %v3294_v15 = vld [vmem:[%s4239_s1 + $0x3e0] ss:$16 sps:$4 sm:$0xff]  }
  0x50   : > { %1805 = vmatprep.subr.bf16.mxu0 %v3206_v16  ;;  %2144 = vmatprep.subr.bf16.mxu1 %v3209_v17  ;;  %v3297_v16 = vld [vmem:[%s4239_s1 + $0x3e8] ss:$16 sps:$4 sm:$0xff]   ;;  %v3305_v17 = vld [vmem:[%s4239_s1 + $0x404] ss:$16 sps:$4 sm:$0xff]  }
  0x51   : > { %1738 = vmatprep.mubr.bf16.mxu0 %v3210_v18  ;;  %2077 = vmatprep.mubr.bf16.mxu1 %v3210_v18  ;;  %v3308_v18 = vld [vmem:[%s4239_s1 + $0x40c] ss:$16 sps:$4 sm:$0xff]  }
  0x53   : > { %1806 = vmatpush1.bf16.msra.mxu0 %v3204_v19  ;;  %2145 = vmatpush1.bf16.msra.mxu1 %v3207_v20  ;;  %v3300_v19 = vld [vmem:[%s3644_s21 + $0x8] ss:$24 sps:$4 sm:$0xff]  }
  0x54   : > { %1807 = vmatprep.subr.bf16.mxu0 %v3215_v21  ;;  %2146 = vmatprep.subr.bf16.mxu1 %v3218_v22  ;;  %v3303_v20 = vld [vmem:[%s4239_s1 + $0x400] ss:$16 sps:$4 sm:$0xff]   ;;  %v3306_v21 = vld [vmem:[%s4239_s1 + $0x408] ss:$16 sps:$4 sm:$0xff]   ;;  %v3311_v22 = vld [vmem:[%s4239_s1 + $0x424] ss:$16 sps:$4 sm:$0xff]  }
  0x56   : > { %1739 = vmatmul.mubr.bf16.gmra.mrb[8].mxu0 %v3212_v23  ;;  %2078 = vmatmul.mubr.bf16.gmra.mrb[8].mxu1 %v3212_v23  ;;  %v3314_v23 = vld [vmem:[%s4239_s1 + $0x42c] ss:$16 sps:$4 sm:$0xff]  }
  0x57   : > { %1808 = vmatpush1.bf16.msra.mxu0 %v3213_v24  ;;  %2147 = vmatpush1.bf16.msra.mxu1 %v3216_v25  ;;  %v3315_v24 = vld [vmem:[%s3644_s21 + $0x3c] ss:$24 sps:$4 sm:$0xff]   ;;  %v3309_v25 = vld [vmem:[%s4239_s1 + $0x420] ss:$16 sps:$4 sm:$0xff]  }
  0x58   : > { %1809 = vmatprep.subr.bf16.mxu0 %v3221_v26  ;;  %2148 = vmatprep.subr.bf16.mxu1 %v3224_v27  ;;  %v3312_v26 = vld [vmem:[%s4239_s1 + $0x428] ss:$16 sps:$4 sm:$0xff]   ;;  %v3320_v27 = vld [vmem:[%s4239_s1 + $0x444] ss:$16 sps:$4 sm:$0xff]  }
  0x59   : > { %1748 = vmatprep.mubr.bf16.mxu0 %v3225_v28  ;;  %2087 = vmatprep.mubr.bf16.mxu1 %v3225_v28  ;;  %v3323_v28 = vld [vmem:[%s4239_s1 + $0x44c] ss:$16 sps:$4 sm:$0xff]  }
  0x5b   : > { %1810 = vmatpush1.bf16.msra.mxu0 %v3219_v29  ;;  %2149 = vmatpush1.bf16.msra.mxu1 %v3222_v30  ;;  %v3317_v29 = vld [vmem:[%s3644_s21 + $0x38] ss:$24 sps:$4 sm:$0xff]  }
  0x5c   : > { %1811 = vmatprep.subr.bf16.mxu0 %v3230_v31  ;;  %2150 = vmatprep.subr.bf16.mxu1 %v3233_v32  ;;  %v3318_v30 = vld [vmem:[%s4239_s1 + $0x440] ss:$16 sps:$4 sm:$0xff]   ;;  %v3321_v31 = vld [vmem:[%s4239_s1 + $0x448] ss:$16 sps:$4 sm:$0xff]   ;;  %v3326_v32 = vld [vmem:[%s4239_s1 + $0x464] ss:$16 sps:$4 sm:$0xff]  }
  0x5e   : > { %1749 = vmatmul.mubr.bf16.gmra.mrb[12].mxu0 %v3227_v33  ;;  %2088 = vmatmul.mubr.bf16.gmra.mrb[12].mxu1 %v3227_v33  ;;  %v3329_v33 = vld [vmem:[%s4239_s1 + $0x46c] ss:$16 sps:$4 sm:$0xff]  }
  0x5f   : > { %1812 = vmatpush1.bf16.msra.mxu0 %v3228_v34  ;;  %2151 = vmatpush1.bf16.msra.mxu1 %v3231_v35  ;;  %v3330_v34 = vld [vmem:[%s3644_s21 + $0x6c] ss:$24 sps:$4 sm:$0xff]   ;;  %v3324_v35 = vld [vmem:[%s4239_s1 + $0x460] ss:$16 sps:$4 sm:$0xff]  }
  0x60   : > { %1813 = vmatprep.subr.bf16.mxu0 %v3236_v36  ;;  %2152 = vmatprep.subr.bf16.mxu1 %v3239_v37  ;;  %v3327_v36 = vld [vmem:[%s4239_s1 + $0x468] ss:$16 sps:$4 sm:$0xff]   ;;  %v3335_v37 = vld [vmem:[%s4239_s1 + $0x484] ss:$16 sps:$4 sm:$0xff]  }
  0x61   : > { %1758 = vmatprep.mubr.bf16.mxu0 %v3240_v38  ;;  %2097 = vmatprep.mubr.bf16.mxu1 %v3240_v38  ;;  %v3338_v38 = vld [vmem:[%s4239_s1 + $0x48c] ss:$16 sps:$4 sm:$0xff]  }
  0x63   : > { %1814 = vmatpush1.bf16.msra.mxu0 %v3234_v39  ;;  %2153 = vmatpush1.bf16.msra.mxu1 %v3237_v40  ;;  %v3332_v39 = vld [vmem:[%s3644_s21 + $0x68] ss:$24 sps:$4 sm:$0xff]  }
  0x64   : > { %1815 = vmatprep.subr.bf16.mxu0 %v3245_v41  ;;  %2154 = vmatprep.subr.bf16.mxu1 %v3248_v42  ;;  %v3333_v40 = vld [vmem:[%s4239_s1 + $0x480] ss:$16 sps:$4 sm:$0xff]   ;;  %v3336_v41 = vld [vmem:[%s4239_s1 + $0x488] ss:$16 sps:$4 sm:$0xff]   ;;  %v3341_v42 = vld [vmem:[%s4239_s1 + $0x4a4] ss:$16 sps:$4 sm:$0xff]  }
  0x66   : > { %1759 = vmatmul.mubr.bf16.gmra.mrb[16].mxu0 %v3242_v43  ;;  %2098 = vmatmul.mubr.bf16.gmra.mrb[16].mxu1 %v3242_v43  ;;  %v3344_v43 = vld [vmem:[%s4239_s1 + $0x4ac] ss:$16 sps:$4 sm:$0xff]  }
  0x67   : > { %1816 = vmatpush1.bf16.msra.mxu0 %v3243_v44  ;;  %2155 = vmatpush1.bf16.msra.mxu1 %v3246_v45  ;;  %v3345_v44 = vld [vmem:[%s3644_s21 + $0x9c] ss:$24 sps:$4 sm:$0xff]   ;;  %v3339_v45 = vld [vmem:[%s4239_s1 + $0x4a0] ss:$16 sps:$4 sm:$0xff]  }
  0x68   : > { %1817 = vmatprep.subr.bf16.mxu0 %v3251_v46  ;;  %2156 = vmatprep.subr.bf16.mxu1 %v3254_v47  ;;  %v3342_v46 = vld [vmem:[%s4239_s1 + $0x4a8] ss:$16 sps:$4 sm:$0xff]   ;;  %v3350_v47 = vld [vmem:[%s4239_s1 + $0x4c4] ss:$16 sps:$4 sm:$0xff]  }
  0x69   : > { %1768 = vmatprep.mubr.bf16.mxu0 %v3255_v48  ;;  %2107 = vmatprep.mubr.bf16.mxu1 %v3255_v48  ;;  %v3353_v48 = vld [vmem:[%s4239_s1 + $0x4cc] ss:$16 sps:$4 sm:$0xff]  }
  0x6b   : > { %1818 = vmatpush1.bf16.msra.mxu0 %v3249_v49  ;;  %2157 = vmatpush1.bf16.msra.mxu1 %v3252_v50  ;;  %v3347_v49 = vld [vmem:[%s3644_s21 + $0x98] ss:$24 sps:$4 sm:$0xff]  }
  0x6c   : > { %1819 = vmatprep.subr.bf16.mxu0 %v3260_v51  ;;  %2158 = vmatprep.subr.bf16.mxu1 %v3263_v52  ;;  %v3348_v50 = vld [vmem:[%s4239_s1 + $0x4c0] ss:$16 sps:$4 sm:$0xff]   ;;  %v3351_v51 = vld [vmem:[%s4239_s1 + $0x4c8] ss:$16 sps:$4 sm:$0xff]   ;;  %v3356_v52 = vld [vmem:[%s4239_s1 + $0x4e4] ss:$16 sps:$4 sm:$0xff]  }
  0x6e   : > { %1769 = vmatmul.mubr.bf16.gmra.mrb[20].mxu0 %v3257_v53  ;;  %2108 = vmatmul.mubr.bf16.gmra.mrb[20].mxu1 %v3257_v53  ;;  %v3359_v53 = vld [vmem:[%s4239_s1 + $0x4ec] ss:$16 sps:$4 sm:$0xff]  }
  0x6f   : > { %1820 = vmatpush1.bf16.msra.mxu0 %v3258_v54  ;;  %2159 = vmatpush1.bf16.msra.mxu1 %v3261_v55  ;;  %v3360_v54 = vld [vmem:[%s3644_s21 + $0xcc] ss:$24 sps:$4 sm:$0xff]   ;;  %v3354_v55 = vld [vmem:[%s4239_s1 + $0x4e0] ss:$16 sps:$4 sm:$0xff]  }
  0x70   : > { %1821 = vmatprep.subr.bf16.mxu0 %v3266_v56  ;;  %2160 = vmatprep.subr.bf16.mxu1 %v3269_v57  ;;  %v3357_v56 = vld [vmem:[%s4239_s1 + $0x4e8] ss:$16 sps:$4 sm:$0xff]   ;;  %v3365_v57 = vld [vmem:[%s4239_s1 + $0x504] ss:$16 sps:$4 sm:$0xff]  }
  0x71   : > { %1778 = vmatprep.mubr.bf16.mxu0 %v3270_v58  ;;  %2117 = vmatprep.mubr.bf16.mxu1 %v3270_v58  ;;  %v3368_v58 = vld [vmem:[%s4239_s1 + $0x50c] ss:$16 sps:$4 sm:$0xff]  }
  0x73   : > { %1822 = vmatpush1.bf16.msra.mxu0 %v3264_v59  ;;  %2161 = vmatpush1.bf16.msra.mxu1 %v3267_v60  ;;  %v3362_v59 = vld [vmem:[%s3644_s21 + $0xc8] ss:$24 sps:$4 sm:$0xff]  }
  0x74   : > { %1823 = vmatprep.subr.bf16.mxu0 %v3275_v61  ;;  %2162 = vmatprep.subr.bf16.mxu1 %v3278_v62  ;;  %v3363_v60 = vld [vmem:[%s4239_s1 + $0x500] ss:$16 sps:$4 sm:$0xff]   ;;  %v3366_v61 = vld [vmem:[%s4239_s1 + $0x508] ss:$16 sps:$4 sm:$0xff]   ;;  %v3371_v62 = vld [vmem:[%s4239_s1 + $0x524] ss:$16 sps:$4 sm:$0xff]  }
  0x76   : > { %1779 = vmatmul.mubr.bf16.gmra.mrb[24].mxu0 %v3272_v63  ;;  %2118 = vmatmul.mubr.bf16.gmra.mrb[24].mxu1 %v3272_v63  ;;  %v3374_v63 = vld [vmem:[%s4239_s1 + $0x52c] ss:$16 sps:$4 sm:$0xff]  }
  0x77   : > { %1824 = vmatpush1.bf16.msra.mxu0 %v3273_v0  ;;  %2163 = vmatpush1.bf16.msra.mxu1 %v3276_v1  ;;  %v3375_v0 = vld [vmem:[%s3644_s21 + $0xfc] ss:$24 sps:$4 sm:$0xff]   ;;  %v3369_v1 = vld [vmem:[%s4239_s1 + $0x520] ss:$16 sps:$4 sm:$0xff]  }
  0x78   : > { %1825 = vmatprep.subr.bf16.mxu0 %v3281_v2  ;;  %2164 = vmatprep.subr.bf16.mxu1 %v3284_v3  ;;  %v3372_v2 = vld [vmem:[%s4239_s1 + $0x528] ss:$16 sps:$4 sm:$0xff]   ;;  %v3380_v3 = vld [vmem:[%s4239_s1 + $0x544] ss:$16 sps:$4 sm:$0xff]  }
  0x79   : > { %1788 = vmatprep.mubr.bf16.mxu0 %v3285_v4  ;;  %2127 = vmatprep.mubr.bf16.mxu1 %v3285_v4  ;;  %v3383_v4 = vld [vmem:[%s4239_s1 + $0x54c] ss:$16 sps:$4 sm:$0xff]  }
  0x7b   : > { %1826 = vmatpush1.bf16.msra.mxu0 %v3279_v5  ;;  %2165 = vmatpush1.bf16.msra.mxu1 %v3282_v6  ;;  %v3377_v5 = vld [vmem:[%s3644_s21 + $0xf8] ss:$24 sps:$4 sm:$0xff]  }
  0x7c   : > { %1827 = vmatprep.subr.bf16.mxu0 %v3290_v7  ;;  %2166 = vmatprep.subr.bf16.mxu1 %v3293_v8  ;;  %v3378_v6 = vld [vmem:[%s4239_s1 + $0x540] ss:$16 sps:$4 sm:$0xff]   ;;  %v3381_v7 = vld [vmem:[%s4239_s1 + $0x548] ss:$16 sps:$4 sm:$0xff]   ;;  %v3386_v8 = vld [vmem:[%s4239_s1 + $0x564] ss:$16 sps:$4 sm:$0xff]  }
  0x7e   : > { %1789 = vmatmul.mubr.bf16.gmra.mrb[28].mxu0 %v3287_v9  ;;  %2128 = vmatmul.mubr.bf16.gmra.mrb[28].mxu1 %v3287_v9  ;;  %v3389_v9 = vld [vmem:[%s4239_s1 + $0x56c] ss:$16 sps:$4 sm:$0xff]  }
  0x7f   : > { %1828 = vmatpush1.bf16.msra.mxu0 %v3288_v10  ;;  %2167 = vmatpush1.bf16.msra.mxu1 %v3291_v11  ;;  %v3390_v10 = vld [vmem:[%s3644_s21 + $0x12c] ss:$24 sps:$4 sm:$0xff]   ;;  %v3384_v11 = vld [vmem:[%s4239_s1 + $0x560] ss:$16 sps:$4 sm:$0xff]  }
  0x80   : > { %1829 = vmatprep.subr.bf16.mxu0 %v3296_v12  ;;  %2168 = vmatprep.subr.bf16.mxu1 %v3299_v13  ;;  %v3387_v12 = vld [vmem:[%s4239_s1 + $0x568] ss:$16 sps:$4 sm:$0xff]   ;;  %v3395_v13 = vld [vmem:[%s4239_s1 + $0x584] ss:$16 sps:$4 sm:$0xff]  }
  0x81   : > { %1831 = vmatprep.mubr.bf16.mxu0 %v3302_v14  ;;  %2170 = vmatprep.mubr.bf16.mxu1 %v3302_v14  ;;  %v3398_v14 = vld [vmem:[%s4239_s1 + $0x58c] ss:$16 sps:$4 sm:$0xff]  }
  0x83   : > { %1830 = vmatpush1.bf16.msra.mxu0 %v3294_v15  ;;  %2169 = vmatpush1.bf16.msra.mxu1 %v3297_v16  ;;  %v3392_v15 = vld [vmem:[%s3644_s21 + $0x128] ss:$24 sps:$4 sm:$0xff]  }
  0x84   : > { %1912 = vmatprep.subr.bf16.mxu0 %v3305_v17  ;;  %2251 = vmatprep.subr.bf16.mxu1 %v3308_v18  ;;  %v3393_v16 = vld [vmem:[%s4239_s1 + $0x580] ss:$16 sps:$4 sm:$0xff]   ;;  %v3396_v17 = vld [vmem:[%s4239_s1 + $0x588] ss:$16 sps:$4 sm:$0xff]   ;;  %v3401_v18 = vld [vmem:[%s4239_s1 + $0x5a4] ss:$16 sps:$4 sm:$0xff]  }
  0x86   : > { %1832 = vmatmul.mubr.bf16.vlgmr.msra.gmra.mrb[0].mxu0 %v3300_v19  ;;  %2171 = vmatmul.mubr.bf16.vlgmr.msra.gmra.mrb[0].mxu1 %v3300_v19  ;;  %v3404_v19 = vld [vmem:[%s4239_s1 + $0x5ac] ss:$16 sps:$4 sm:$0xff]  }
  0x87   : > { %1913 = vmatpush1.bf16.msra.mxu0 %v3303_v20  ;;  %2252 = vmatpush1.bf16.msra.mxu1 %v3306_v21  ;;  %v3405_v20 = vld [vmem:[%s3644_s21 + $0x15c] ss:$24 sps:$4 sm:$0xff]   ;;  %v3399_v21 = vld [vmem:[%s4239_s1 + $0x5a0] ss:$16 sps:$4 sm:$0xff]  }
  0x88   : > { %1914 = vmatprep.subr.bf16.mxu0 %v3311_v22  ;;  %2253 = vmatprep.subr.bf16.mxu1 %v3314_v23  ;;  %v3402_v22 = vld [vmem:[%s4239_s1 + $0x5a8] ss:$16 sps:$4 sm:$0xff]   ;;  %v3410_v23 = vld [vmem:[%s4239_s1 + $0x5c4] ss:$16 sps:$4 sm:$0xff]  }
  0x89   : > { %1841 = vmatprep.mubr.bf16.mxu0 %v3315_v24  ;;  %2180 = vmatprep.mubr.bf16.mxu1 %v3315_v24  ;;  %v3413_v24 = vld [vmem:[%s4239_s1 + $0x5cc] ss:$16 sps:$4 sm:$0xff]  }
  0x8b   : > { %1915 = vmatpush1.bf16.msra.mxu0 %v3309_v25  ;;  %2254 = vmatpush1.bf16.msra.mxu1 %v3312_v26  ;;  %v3407_v25 = vld [vmem:[%s3644_s21 + $0x158] ss:$24 sps:$4 sm:$0xff]  }
  0x8c   : > { %1916 = vmatprep.subr.bf16.mxu0 %v3320_v27  ;;  %2255 = vmatprep.subr.bf16.mxu1 %v3323_v28  ;;  %v3408_v26 = vld [vmem:[%s4239_s1 + $0x5c0] ss:$16 sps:$4 sm:$0xff]   ;;  %v3411_v27 = vld [vmem:[%s4239_s1 + $0x5c8] ss:$16 sps:$4 sm:$0xff]   ;;  %v3416_v28 = vld [vmem:[%s4239_s1 + $0x5e4] ss:$16 sps:$4 sm:$0xff]  }
  0x8e   : > { %1842 = vmatmul.mubr.bf16.gmra.mrb[4].mxu0 %v3317_v29  ;;  %2181 = vmatmul.mubr.bf16.gmra.mrb[4].mxu1 %v3317_v29  ;;  %v3419_v29 = vld [vmem:[%s4239_s1 + $0x5ec] ss:$16 sps:$4 sm:$0xff]  }
  0x8f   : > { %1917 = vmatpush1.bf16.msra.mxu0 %v3318_v30  ;;  %2256 = vmatpush1.bf16.msra.mxu1 %v3321_v31  ;;  %v3422_v30 = vld [vmem:[%s3644_s21 + $0x14] ss:$24 sps:$4 sm:$0xff]   ;;  %v3414_v31 = vld [vmem:[%s4239_s1 + $0x5e0] ss:$16 sps:$4 sm:$0xff]  }
  0x90   : > { %1918 = vmatprep.subr.bf16.mxu0 %v3326_v32  ;;  %2257 = vmatprep.subr.bf16.mxu1 %v3329_v33  ;;  %v3417_v32 = vld [vmem:[%s4239_s1 + $0x5e8] ss:$16 sps:$4 sm:$0xff]  }
  0x91   : > { %1851 = vmatprep.mubr.bf16.mxu0 %v3330_v34  ;;  %2190 = vmatprep.mubr.bf16.mxu1 %v3330_v34  ;;  %v3420_v33 = vld [vmem:[%s3644_s21 + $0x10] ss:$24 sps:$4 sm:$0xff]   ;;  %v3423_v34 = vld [vmem:[%s3644_s21 + $0x44] ss:$24 sps:$4 sm:$0xff]  }
  0x93   : > { %1919 = vmatpush1.bf16.msra.mxu0 %v3324_v35  ;;  %2258 = vmatpush1.bf16.msra.mxu1 %v3327_v36  ;;  %v3425_v35 = vld [vmem:[%s3644_s21 + $0x40] ss:$24 sps:$4 sm:$0xff]   ;;  %v3426_v36 = vld [vmem:[%s3644_s21 + $0x74] ss:$24 sps:$4 sm:$0xff]  }
  0x94   : > { %1920 = vmatprep.subr.bf16.mxu0 %v3335_v37  ;;  %2259 = vmatprep.subr.bf16.mxu1 %v3338_v38  ;;  %v3428_v37 = vld [vmem:[%s3644_s21 + $0x70] ss:$24 sps:$4 sm:$0xff]   ;;  %v3429_v38 = vld [vmem:[%s3644_s21 + $0xa4] ss:$24 sps:$4 sm:$0xff]  }
  0x96   : > { %1852 = vmatmul.mubr.bf16.gmra.mrb[8].mxu0 %v3332_v39  ;;  %2191 = vmatmul.mubr.bf16.gmra.mrb[8].mxu1 %v3332_v39  ;;  %v3431_v39 = vld [vmem:[%s3644_s21 + $0xa0] ss:$24 sps:$4 sm:$0xff]  }
  0x97   : > { %1921 = vmatpush1.bf16.msra.mxu0 %v3333_v40  ;;  %2260 = vmatpush1.bf16.msra.mxu1 %v3336_v41  ;;  %v3432_v40 = vld [vmem:[%s3644_s21 + $0xd4] ss:$24 sps:$4 sm:$0xff]   ;;  %v3434_v41 = vld [vmem:[%s3644_s21 + $0xd0] ss:$24 sps:$4 sm:$0xff]  }
  0x98   : > { %1922 = vmatprep.subr.bf16.mxu0 %v3341_v42  ;;  %2261 = vmatprep.subr.bf16.mxu1 %v3344_v43  ;;  %v3435_v42 = vld [vmem:[%s3644_s21 + $0x104] ss:$24 sps:$4 sm:$0xff]   ;;  %v3437_v43 = vld [vmem:[%s3644_s21 + $0x100] ss:$24 sps:$4 sm:$0xff]  }
  0x99   : > { %1861 = vmatprep.mubr.bf16.mxu0 %v3345_v44  ;;  %2200 = vmatprep.mubr.bf16.mxu1 %v3345_v44  ;;  %v3438_v44 = vld [vmem:[%s3644_s21 + $0x134] ss:$24 sps:$4 sm:$0xff]  }
  0x9b   : > { %1923 = vmatpush1.bf16.msra.mxu0 %v3339_v45  ;;  %2262 = vmatpush1.bf16.msra.mxu1 %v3342_v46  ;;  %v3440_v45 = vld [vmem:[%s3644_s21 + $0x130] ss:$24 sps:$4 sm:$0xff]   ;;  %v3441_v46 = vld [vmem:[%s3644_s21 + $0x164] ss:$24 sps:$4 sm:$0xff]  }
  0x9c   : > { %1924 = vmatprep.subr.bf16.mxu0 %v3350_v47  ;;  %2263 = vmatprep.subr.bf16.mxu1 %v3353_v48  ;;  %v3443_v47 = vld [vmem:[%s3644_s21 + $0x160] ss:$24 sps:$4 sm:$0xff]  }
  0x9d   : > { %v4138_v48 = vld [vmem:[%s4241_s3] sm:$0xff] }
  0x9e   : > { %1862 = vmatmul.mubr.bf16.gmra.mrb[12].mxu0 %v3347_v49  ;;  %2201 = vmatmul.mubr.bf16.gmra.mrb[12].mxu1 %v3347_v49  ;;  %v4143_v49 = vld [vmem:[%s4241_s3 + $0x8] sm:$0xff] }
  0x9f   : > { %1925 = vmatpush1.bf16.msra.mxu0 %v3348_v50  ;;  %2264 = vmatpush1.bf16.msra.mxu1 %v3351_v51  ;;  %v2874_v50 = vcombine.high %v4138_v48, %v4138_v48  ;;  %v2876_v51 = vcombine.high %v4143_v49, %v4143_v49 }
  0xa0   : > { %1926 = vmatprep.subr.bf16.mxu0 %v3356_v52  ;;  %2265 = vmatprep.subr.bf16.mxu1 %v3359_v53  ;;  %v2462_v52 = vld [vmem:[%s4242_s4] sm:$0xff]  ;;  %v3460_v53 = vmov 0  }
  0xa1   : > { %1871 = vmatprep.mubr.bf16.mxu0 %v3360_v54  ;;  %2210 = vmatprep.mubr.bf16.mxu1 %v3360_v54  ;;  %v466_v54 = vlaneseq }
  0xa2   : > { %3083 = vset.pattern.permute.xlu0 %v3460_v53 }
  0xa3   : > { %1927 = vmatpush1.bf16.msra.mxu0 %v3354_v55  ;;  %2266 = vmatpush1.bf16.msra.mxu1 %v3357_v56  ;;  %v467_v55 = vshrl.u32 %v466_v54, 7 }
  0xa4   : > { %1928 = vmatprep.subr.bf16.mxu0 %v3365_v57  ;;  %2267 = vmatprep.subr.bf16.mxu1 %v3368_v58  ;;  %v464_v58 = vld [vmem:[%s4240_s2] sm:$0xf] }
  0xa5   : > { %2465 = vperm.xlu0 %3083, %v2462_v52   ;;  %v468_v56 = vsub.s32 0, %v467_v55  ;;  %v476_v57 = vsub.s32 2, %v467_v55 }
  0xa6   : > { %1872 = vmatmul.mubr.bf16.gmra.mrb[16].mxu0 %v3362_v59  ;;  %2211 = vmatmul.mubr.bf16.gmra.mrb[16].mxu1 %v3362_v59  ;;  %v472_v59 = vsub.s32 1, %v467_v55 }
  0xa7   : > { %1929 = vmatpush1.bf16.msra.mxu0 %v3363_v60  ;;  %2268 = vmatpush1.bf16.msra.mxu1 %v3366_v61  ;;  %v480_v60 = vsub.s32 3, %v467_v55  ;;  %v4155_v61 = vrot.slane %v464_v58, %v468_v56 }
  0xa8   : > { %1930 = vmatprep.subr.bf16.mxu0 %v3371_v62  ;;  %2269 = vmatprep.subr.bf16.mxu1 %v3374_v63  ;;  %v4157_v62 = vrot.slane %v464_v58, %v476_v57  ;;  %v4159_v63 = vrot.slane %v464_v58, %v472_v59 }
  0xa9   : > { %1881 = vmatprep.mubr.bf16.mxu0 %v3375_v0  ;;  %2220 = vmatprep.mubr.bf16.mxu1 %v3375_v0  ;;  %v4161_v0 = vrot.slane %v464_v58, %v480_v60 }
  0xab   : > { %1931 = vmatpush1.bf16.msra.mxu0 %v3369_v1  ;;  %2270 = vmatpush1.bf16.msra.mxu1 %v3372_v2 }
  0xac   : > { %1932 = vmatprep.subr.bf16.mxu0 %v3380_v3  ;;  %2271 = vmatprep.subr.bf16.mxu1 %v3383_v4 }
  0xae   : > { %1882 = vmatmul.mubr.bf16.gmra.mrb[20].mxu0 %v3377_v5  ;;  %2221 = vmatmul.mubr.bf16.gmra.mrb[20].mxu1 %v3377_v5 }
  0xaf   : > { %1933 = vmatpush1.bf16.msra.mxu0 %v3378_v6  ;;  %2272 = vmatpush1.bf16.msra.mxu1 %v3381_v7 }
  0xb0   : > { %1934 = vmatprep.subr.bf16.mxu0 %v3386_v8  ;;  %2273 = vmatprep.subr.bf16.mxu1 %v3389_v9 }
  0xb1   : > { %1891 = vmatprep.mubr.bf16.mxu0 %v3390_v10  ;;  %2230 = vmatprep.mubr.bf16.mxu1 %v3390_v10 }
  0xb3   : > { %1935 = vmatpush1.bf16.msra.mxu0 %v3384_v11  ;;  %2274 = vmatpush1.bf16.msra.mxu1 %v3387_v12 }
  0xb4   : > { %1936 = vmatprep.subr.bf16.mxu0 %v3395_v13  ;;  %2275 = vmatprep.subr.bf16.mxu1 %v3398_v14 }
  0xb6   : > { %1892 = vmatmul.mubr.bf16.gmra.mrb[24].mxu0 %v3392_v15  ;;  %2231 = vmatmul.mubr.bf16.gmra.mrb[24].mxu1 %v3392_v15 }
  0xb7   : > { %1937 = vmatpush1.bf16.msra.mxu0 %v3393_v16  ;;  %2276 = vmatpush1.bf16.msra.mxu1 %v3396_v17 }
  0xb8   : > { %1938 = vmatprep.subr.bf16.mxu0 %v3401_v18  ;;  %2277 = vmatprep.subr.bf16.mxu1 %v3404_v19 }
  0xb9   : > { %1901 = vmatprep.mubr.bf16.mxu0 %v3405_v20  ;;  %2240 = vmatprep.mubr.bf16.mxu1 %v3405_v20 }
  0xbb   : > { %1939 = vmatpush1.bf16.msra.mxu0 %v3399_v21  ;;  %2278 = vmatpush1.bf16.msra.mxu1 %v3402_v22 }
  0xbc   : > { %1940 = vmatprep.subr.bf16.mxu0 %v3410_v23  ;;  %2279 = vmatprep.subr.bf16.mxu1 %v3413_v24 }
  0xbe   : > { %1902 = vmatmul.mubr.bf16.gmra.mrb[28].mxu0 %v3407_v25  ;;  %2241 = vmatmul.mubr.bf16.gmra.mrb[28].mxu1 %v3407_v25 }
  0xbf   : > { %1941 = vmatpush1.bf16.msra.mxu0 %v3408_v26  ;;  %2280 = vmatpush1.bf16.msra.mxu1 %v3411_v27 }
  0xc0   : > { %1942 = vmatprep.subr.bf16.mxu0 %v3416_v28  ;;  %2281 = vmatprep.subr.bf16.mxu1 %v3419_v29 }
  0xc1   : > { %1944 = vmatprep.mubr.bf16.mxu0 %v3422_v30  ;;  %2283 = vmatprep.mubr.bf16.mxu1 %v3422_v30 }
  0xc3   : > { %1943 = vmatpush1.bf16.msra.mxu0 %v3414_v31  ;;  %2282 = vmatpush1.bf16.msra.mxu1 %v3417_v32 }
  0xc6   : > { %1945 = vmatmul.mubr.bf16.vlgmr.msra.gmra.mrb[0].mxu0 %v3420_v33  ;;  %2284 = vmatmul.mubr.bf16.vlgmr.msra.gmra.mrb[0].mxu1 %v3420_v33 }
  0xc7   : > { %1954 = vmatprep.mubr.bf16.mxu0 %v3423_v34  ;;  %2293 = vmatprep.mubr.bf16.mxu1 %v3423_v34 }
  0xce   : > { %1955 = vmatmul.mubr.bf16.gmra.mrb[4].mxu0 %v3425_v35  ;;  %2294 = vmatmul.mubr.bf16.gmra.mrb[4].mxu1 %v3425_v35 }
  0xcf   : > { %1964 = vmatprep.mubr.bf16.mxu0 %v3426_v36  ;;  %2303 = vmatprep.mubr.bf16.mxu1 %v3426_v36 }
  0xd6   : > { %1965 = vmatmul.mubr.bf16.gmra.mrb[8].mxu0 %v3428_v37  ;;  %2304 = vmatmul.mubr.bf16.gmra.mrb[8].mxu1 %v3428_v37 }
  0xd7   : > { %1974 = vmatprep.mubr.bf16.mxu0 %v3429_v38  ;;  %2313 = vmatprep.mubr.bf16.mxu1 %v3429_v38 }
  0xde   : > { %1975 = vmatmul.mubr.bf16.gmra.mrb[12].mxu0 %v3431_v39  ;;  %2314 = vmatmul.mubr.bf16.gmra.mrb[12].mxu1 %v3431_v39 }
  0xdf   : > { %1984 = vmatprep.mubr.bf16.mxu0 %v3432_v40  ;;  %2323 = vmatprep.mubr.bf16.mxu1 %v3432_v40 }
  0xe6   : > { %1985 = vmatmul.mubr.bf16.gmra.mrb[16].mxu0 %v3434_v41  ;;  %2324 = vmatmul.mubr.bf16.gmra.mrb[16].mxu1 %v3434_v41 }
  0xe7   : > { %1994 = vmatprep.mubr.bf16.mxu0 %v3435_v42  ;;  %2333 = vmatprep.mubr.bf16.mxu1 %v3435_v42 }
  0xee   : > { %1995 = vmatmul.mubr.bf16.gmra.mrb[20].mxu0 %v3437_v43  ;;  %2334 = vmatmul.mubr.bf16.gmra.mrb[20].mxu1 %v3437_v43 }
  0xef   : > { %2004 = vmatprep.mubr.bf16.mxu0 %v3438_v44  ;;  %2343 = vmatprep.mubr.bf16.mxu1 %v3438_v44 }
  0xf6   : > { %2005 = vmatmul.mubr.bf16.gmra.mrb[24].mxu0 %v3440_v45  ;;  %2344 = vmatmul.mubr.bf16.gmra.mrb[24].mxu1 %v3440_v45 }
  0xf7   : > { %2014 = vmatprep.mubr.bf16.mxu0 %v3441_v46  ;;  %2353 = vmatprep.mubr.bf16.mxu1 %v3441_v46 }
  0xfe   : > { %2015 = vmatmul.mubr.bf16.gmra.mrb[28].mxu0 %v3443_v47  ;;  %2354 = vmatmul.mubr.bf16.gmra.mrb[28].mxu1 %v3443_v47 }
  0xff   : > { %2514 = vmatprep.mubr.bf16.mxu1 %v2874_v50  ;;  %2554 = vmatprep.mubr.bf16.mxu0 %v2876_v51 }
 0x199   : > { %v1946_v1 = vpop.f32.mrb[0].mxu0  ;;  %v2285_v2 = vpop.f32.mrb[0].mxu1 }
 0x19a   : > { %v2879_v3 = vadd.f32 %v1946_v1, %v4155_v61  ;;  %v2911_v4 = vadd.f32 %v2285_v2, %v4157_v62  ;;  %v1948_v5 = vpop.f32.mrb[1].mxu0  ;;  %v2287_v6 = vpop.f32.mrb[1].mxu1 }
 0x19b   : > { %v2880_v7 = vadd.f32 %v1948_v5, %v4159_v63  ;;  %v2912_v8 = vadd.f32 %v2287_v6, %v4161_v0  ;;  %v1950_v9 = vpop.f32.mrb[2].mxu0  ;;  %v2289_v10 = vpop.f32.mrb[2].mxu1 }
 0x19c   : > { %v2881_v11 = vadd.f32 %v1950_v9, %v4155_v61  ;;  %v2913_v12 = vadd.f32 %v2289_v10, %v4157_v62  ;;  %v1952_v13 = vpop.f32.mrb[3].mxu0  ;;  %v2291_v14 = vpop.f32.mrb[3].mxu1  ;;  %v2364_v17 = vmax.f32 %v2879_v3, 0.0  ;;  %v2366_v18 = vmax.f32 %v2911_v4, 0.0 }
 0x19d   : > { %v2882_v15 = vadd.f32 %v1952_v13, %v4159_v63  ;;  %v2914_v16 = vadd.f32 %v2291_v14, %v4161_v0  ;;  %v2365_v21 = vmax.f32 %v2880_v7, 0.0  ;;  %v2367_v22 = vmax.f32 %v2912_v8, 0.0 }
 0x19e   : > { %v2368_v19 = vmax.f32 %v2881_v11, 0.0  ;;  %v2370_v20 = vmax.f32 %v2913_v12, 0.0 }
 0x19f   : > { %v2369_v23 = vmax.f32 %v2882_v15, 0.0  ;;  %v2371_v24 = vmax.f32 %v2914_v16, 0.0 }
 0x1a0   : > { %v2428_v25 = vpack.c.bf16 %v2368_v19, %v2364_v17  ;;  %v2430_v26 = vpack.c.bf16 %v2370_v20, %v2366_v18 }
 0x1a1   : > { %v2429_v27 = vpack.c.bf16 %v2369_v23, %v2365_v21  ;;  %v2431_v28 = vpack.c.bf16 %v2371_v24, %v2367_v22  ;;  %v1956_v29 = vpop.f32.mrb[4].mxu0  ;;  %v2295_v30 = vpop.f32.mrb[4].mxu1 }
 0x1a2   : > { %v2883_v31 = vadd.f32 %v1956_v29, %v4155_v61  ;;  %v2915_v32 = vadd.f32 %v2295_v30, %v4157_v62  ;;  %v1958_v33 = vpop.f32.mrb[5].mxu0  ;;  %v2297_v34 = vpop.f32.mrb[5].mxu1 }
 0x1a3   : > { %v2884_v35 = vadd.f32 %v1958_v33, %v4159_v63  ;;  %v2916_v36 = vadd.f32 %v2297_v34, %v4161_v0  ;;  %v1960_v37 = vpop.f32.mrb[6].mxu0  ;;  %v2299_v38 = vpop.f32.mrb[6].mxu1  ;;  %2482 = vmatprep.subr.bf16.mxu1 %v2429_v27  ;;  %2522 = vmatprep.subr.bf16.mxu0 %v2431_v28 }
 0x1a4   : > { %v2885_v39 = vadd.f32 %v1960_v37, %v4155_v61  ;;  %v2917_v40 = vadd.f32 %v2299_v38, %v4157_v62  ;;  %v1962_v41 = vpop.f32.mrb[7].mxu0  ;;  %v2301_v42 = vpop.f32.mrb[7].mxu1  ;;  %2483 = vmatpush1.bf16.xpose.msra.mxu1 %v2428_v25  ;;  %2523 = vmatpush1.bf16.xpose.msra.mxu0 %v2430_v26  ;;  %v2372_v45 = vmax.f32 %v2883_v31, 0.0  ;;  %v2374_v46 = vmax.f32 %v2915_v32, 0.0 }
 0x1a5   : > { %v2886_v43 = vadd.f32 %v1962_v41, %v4159_v63  ;;  %v2918_v44 = vadd.f32 %v2301_v42, %v4161_v0  ;;  %v2373_v51 = vmax.f32 %v2884_v35, 0.0  ;;  %v2375_v52 = vmax.f32 %v2916_v36, 0.0 }
 0x1a6   : > { %v2376_v47 = vmax.f32 %v2885_v39, 0.0  ;;  %v2378_v50 = vmax.f32 %v2917_v40, 0.0 }
 0x1a7   : > { %v2377_v53 = vmax.f32 %v2886_v43, 0.0  ;;  %v2379_v54 = vmax.f32 %v2918_v44, 0.0 }
 0x1a8   : > { %v2432_v55 = vpack.c.bf16 %v2376_v47, %v2372_v45  ;;  %v2434_v56 = vpack.c.bf16 %v2378_v50, %v2374_v46 }
 0x1a9   : > { %v2433_v57 = vpack.c.bf16 %v2377_v53, %v2373_v51  ;;  %v2435_v58 = vpack.c.bf16 %v2379_v54, %v2375_v52  ;;  %v1966_v59 = vpop.f32.mrb[8].mxu0  ;;  %v2305_v60 = vpop.f32.mrb[8].mxu1 }
 0x1aa   : > { %v2887_v1 = vadd.f32 %v1966_v59, %v4155_v61  ;;  %v2919_v2 = vadd.f32 %v2305_v60, %v4157_v62  ;;  %v1968_v3 = vpop.f32.mrb[9].mxu0  ;;  %v2307_v4 = vpop.f32.mrb[9].mxu1 }
 0x1ab   : > { %v2888_v5 = vadd.f32 %v1968_v3, %v4159_v63  ;;  %v2920_v6 = vadd.f32 %v2307_v4, %v4161_v0  ;;  %v1970_v7 = vpop.f32.mrb[10].mxu0  ;;  %v2309_v8 = vpop.f32.mrb[10].mxu1  ;;  %2484 = vmatprep.subr.bf16.mxu1 %v2433_v57  ;;  %2524 = vmatprep.subr.bf16.mxu0 %v2435_v58 }
 0x1ac   : > { %v2889_v9 = vadd.f32 %v1970_v7, %v4155_v61  ;;  %v2921_v10 = vadd.f32 %v2309_v8, %v4157_v62  ;;  %v1972_v11 = vpop.f32.mrb[11].mxu0  ;;  %v2311_v12 = vpop.f32.mrb[11].mxu1  ;;  %2485 = vmatpush1.bf16.xpose.msra.mxu1 %v2432_v55  ;;  %2525 = vmatpush1.bf16.xpose.msra.mxu0 %v2434_v56  ;;  %v2380_v15 = vmax.f32 %v2887_v1, 0.0  ;;  %v2382_v16 = vmax.f32 %v2919_v2, 0.0 }
 0x1ad   : > { %v2890_v13 = vadd.f32 %v1972_v11, %v4159_v63  ;;  %v2922_v14 = vadd.f32 %v2311_v12, %v4161_v0  ;;  %v2381_v19 = vmax.f32 %v2888_v5, 0.0  ;;  %v2383_v20 = vmax.f32 %v2920_v6, 0.0 }
 0x1ae   : > { %v2384_v17 = vmax.f32 %v2889_v9, 0.0  ;;  %v2386_v18 = vmax.f32 %v2921_v10, 0.0 }
 0x1af   : > { %v2385_v21 = vmax.f32 %v2890_v13, 0.0  ;;  %v2387_v22 = vmax.f32 %v2922_v14, 0.0 }
 0x1b0   : > { %v2436_v23 = vpack.c.bf16 %v2384_v17, %v2380_v15  ;;  %v2438_v24 = vpack.c.bf16 %v2386_v18, %v2382_v16 }
 0x1b1   : > { %v2437_v25 = vpack.c.bf16 %v2385_v21, %v2381_v19  ;;  %v2439_v26 = vpack.c.bf16 %v2387_v22, %v2383_v20  ;;  %v1976_v27 = vpop.f32.mrb[12].mxu0  ;;  %v2315_v28 = vpop.f32.mrb[12].mxu1 }
 0x1b2   : > { %v2891_v29 = vadd.f32 %v1976_v27, %v4155_v61  ;;  %v2923_v30 = vadd.f32 %v2315_v28, %v4157_v62  ;;  %v1978_v31 = vpop.f32.mrb[13].mxu0  ;;  %v2317_v32 = vpop.f32.mrb[13].mxu1 }
 0x1b3   : > { %v2892_v33 = vadd.f32 %v1978_v31, %v4159_v63  ;;  %v2924_v34 = vadd.f32 %v2317_v32, %v4161_v0  ;;  %v1980_v35 = vpop.f32.mrb[14].mxu0  ;;  %v2319_v36 = vpop.f32.mrb[14].mxu1  ;;  %2486 = vmatprep.subr.bf16.mxu1 %v2437_v25  ;;  %2526 = vmatprep.subr.bf16.mxu0 %v2439_v26 }
 0x1b4   : > { %v2893_v37 = vadd.f32 %v1980_v35, %v4155_v61  ;;  %v2925_v38 = vadd.f32 %v2319_v36, %v4157_v62  ;;  %v1982_v39 = vpop.f32.mrb[15].mxu0  ;;  %v2321_v40 = vpop.f32.mrb[15].mxu1  ;;  %2487 = vmatpush1.bf16.xpose.msra.mxu1 %v2436_v23  ;;  %2527 = vmatpush1.bf16.xpose.msra.mxu0 %v2438_v24  ;;  %v2388_v43 = vmax.f32 %v2891_v29, 0.0  ;;  %v2390_v44 = vmax.f32 %v2923_v30, 0.0 }
 0x1b5   : > { %v2894_v41 = vadd.f32 %v1982_v39, %v4159_v63  ;;  %v2926_v42 = vadd.f32 %v2321_v40, %v4161_v0  ;;  %v2389_v47 = vmax.f32 %v2892_v33, 0.0  ;;  %v2391_v50 = vmax.f32 %v2924_v34, 0.0 }
 0x1b6   : > { %v2392_v45 = vmax.f32 %v2893_v37, 0.0  ;;  %v2394_v46 = vmax.f32 %v2925_v38, 0.0 }
 0x1b7   : > { %v2393_v51 = vmax.f32 %v2894_v41, 0.0  ;;  %v2395_v52 = vmax.f32 %v2926_v42, 0.0 }
 0x1b8   : > { %v2440_v53 = vpack.c.bf16 %v2392_v45, %v2388_v43  ;;  %v2442_v54 = vpack.c.bf16 %v2394_v46, %v2390_v44 }
 0x1b9   : > { %v2441_v55 = vpack.c.bf16 %v2393_v51, %v2389_v47  ;;  %v2443_v56 = vpack.c.bf16 %v2395_v52, %v2391_v50  ;;  %v1986_v57 = vpop.f32.mrb[16].mxu0  ;;  %v2325_v58 = vpop.f32.mrb[16].mxu1 }
 0x1ba   : > { %v2895_v59 = vadd.f32 %v1986_v57, %v4155_v61  ;;  %v2927_v60 = vadd.f32 %v2325_v58, %v4157_v62  ;;  %v1988_v1 = vpop.f32.mrb[17].mxu0  ;;  %v2327_v2 = vpop.f32.mrb[17].mxu1 }
 0x1bb   : > { %v2896_v3 = vadd.f32 %v1988_v1, %v4159_v63  ;;  %v2928_v4 = vadd.f32 %v2327_v2, %v4161_v0  ;;  %v1990_v5 = vpop.f32.mrb[18].mxu0  ;;  %v2329_v6 = vpop.f32.mrb[18].mxu1  ;;  %2488 = vmatprep.subr.bf16.mxu1 %v2441_v55  ;;  %2528 = vmatprep.subr.bf16.mxu0 %v2443_v56 }
 0x1bc   : > { %v2897_v7 = vadd.f32 %v1990_v5, %v4155_v61  ;;  %v2929_v8 = vadd.f32 %v2329_v6, %v4157_v62  ;;  %v1992_v9 = vpop.f32.mrb[19].mxu0  ;;  %v2331_v10 = vpop.f32.mrb[19].mxu1  ;;  %2489 = vmatpush1.bf16.xpose.msra.mxu1 %v2440_v53  ;;  %2529 = vmatpush1.bf16.xpose.msra.mxu0 %v2442_v54  ;;  %v2396_v13 = vmax.f32 %v2895_v59, 0.0  ;;  %v2398_v14 = vmax.f32 %v2927_v60, 0.0 }
 0x1bd   : > { %v2898_v11 = vadd.f32 %v1992_v9, %v4159_v63  ;;  %v2930_v12 = vadd.f32 %v2331_v10, %v4161_v0  ;;  %v2397_v17 = vmax.f32 %v2896_v3, 0.0  ;;  %v2399_v18 = vmax.f32 %v2928_v4, 0.0 }
 0x1be   : > { %v2400_v15 = vmax.f32 %v2897_v7, 0.0  ;;  %v2402_v16 = vmax.f32 %v2929_v8, 0.0 }
 0x1bf   : > { %v2401_v19 = vmax.f32 %v2898_v11, 0.0  ;;  %v2403_v20 = vmax.f32 %v2930_v12, 0.0 }
 0x1c0   : > { %v2444_v21 = vpack.c.bf16 %v2400_v15, %v2396_v13  ;;  %v2446_v22 = vpack.c.bf16 %v2402_v16, %v2398_v14 }
 0x1c1   : > { %v2445_v23 = vpack.c.bf16 %v2401_v19, %v2397_v17  ;;  %v2447_v24 = vpack.c.bf16 %v2403_v20, %v2399_v18  ;;  %v1996_v25 = vpop.f32.mrb[20].mxu0  ;;  %v2335_v26 = vpop.f32.mrb[20].mxu1 }
 0x1c2   : > { %v2899_v27 = vadd.f32 %v1996_v25, %v4155_v61  ;;  %v2931_v28 = vadd.f32 %v2335_v26, %v4157_v62  ;;  %v1998_v29 = vpop.f32.mrb[21].mxu0  ;;  %v2337_v30 = vpop.f32.mrb[21].mxu1 }
 0x1c3   : > { %v2900_v31 = vadd.f32 %v1998_v29, %v4159_v63  ;;  %v2932_v32 = vadd.f32 %v2337_v30, %v4161_v0  ;;  %v2000_v33 = vpop.f32.mrb[22].mxu0  ;;  %v2339_v34 = vpop.f32.mrb[22].mxu1  ;;  %2490 = vmatprep.subr.bf16.mxu1 %v2445_v23  ;;  %2530 = vmatprep.subr.bf16.mxu0 %v2447_v24 }
 0x1c4   : > { %v2901_v35 = vadd.f32 %v2000_v33, %v4155_v61  ;;  %v2933_v36 = vadd.f32 %v2339_v34, %v4157_v62  ;;  %v2002_v37 = vpop.f32.mrb[23].mxu0  ;;  %v2341_v38 = vpop.f32.mrb[23].mxu1  ;;  %2491 = vmatpush1.bf16.xpose.msra.mxu1 %v2444_v21  ;;  %2531 = vmatpush1.bf16.xpose.msra.mxu0 %v2446_v22  ;;  %v2404_v41 = vmax.f32 %v2899_v27, 0.0  ;;  %v2406_v42 = vmax.f32 %v2931_v28, 0.0 }
 0x1c5   : > { %v2902_v39 = vadd.f32 %v2002_v37, %v4159_v63  ;;  %v2934_v40 = vadd.f32 %v2341_v38, %v4161_v0  ;;  %v2405_v45 = vmax.f32 %v2900_v31, 0.0  ;;  %v2407_v46 = vmax.f32 %v2932_v32, 0.0 }
 0x1c6   : > { %v2408_v43 = vmax.f32 %v2901_v35, 0.0  ;;  %v2410_v44 = vmax.f32 %v2933_v36, 0.0 }
 0x1c7   : > { %v2409_v47 = vmax.f32 %v2902_v39, 0.0  ;;  %v2411_v50 = vmax.f32 %v2934_v40, 0.0 }
 0x1c8   : > { %v2448_v51 = vpack.c.bf16 %v2408_v43, %v2404_v41  ;;  %v2450_v52 = vpack.c.bf16 %v2410_v44, %v2406_v42 }
 0x1c9   : > { %v2449_v53 = vpack.c.bf16 %v2409_v47, %v2405_v45  ;;  %v2451_v54 = vpack.c.bf16 %v2411_v50, %v2407_v46  ;;  %v2006_v55 = vpop.f32.mrb[24].mxu0  ;;  %v2345_v56 = vpop.f32.mrb[24].mxu1 }
 0x1ca   : > { %v2903_v57 = vadd.f32 %v2006_v55, %v4155_v61  ;;  %v2935_v58 = vadd.f32 %v2345_v56, %v4157_v62  ;;  %v2008_v59 = vpop.f32.mrb[25].mxu0  ;;  %v2347_v60 = vpop.f32.mrb[25].mxu1 }
 0x1cb   : > { %v2904_v1 = vadd.f32 %v2008_v59, %v4159_v63  ;;  %v2936_v2 = vadd.f32 %v2347_v60, %v4161_v0  ;;  %v2010_v3 = vpop.f32.mrb[26].mxu0  ;;  %v2349_v4 = vpop.f32.mrb[26].mxu1  ;;  %2492 = vmatprep.subr.bf16.mxu1 %v2449_v53  ;;  %2532 = vmatprep.subr.bf16.mxu0 %v2451_v54 }
 0x1cc   : > { %v2905_v5 = vadd.f32 %v2010_v3, %v4155_v61  ;;  %v2937_v6 = vadd.f32 %v2349_v4, %v4157_v62  ;;  %v2012_v7 = vpop.f32.mrb[27].mxu0  ;;  %v2351_v8 = vpop.f32.mrb[27].mxu1  ;;  %2493 = vmatpush1.bf16.xpose.msra.mxu1 %v2448_v51  ;;  %2533 = vmatpush1.bf16.xpose.msra.mxu0 %v2450_v52  ;;  %v2412_v11 = vmax.f32 %v2903_v57, 0.0  ;;  %v2414_v12 = vmax.f32 %v2935_v58, 0.0 }
 0x1cd   : > { %v2906_v9 = vadd.f32 %v2012_v7, %v4159_v63  ;;  %v2938_v10 = vadd.f32 %v2351_v8, %v4161_v0  ;;  %v2413_v15 = vmax.f32 %v2904_v1, 0.0  ;;  %v2415_v16 = vmax.f32 %v2936_v2, 0.0  ;;  %v2466_v51 = vpop.permute.xlu0 %2465 }
 0x1ce   : > { %v2416_v13 = vmax.f32 %v2905_v5, 0.0  ;;  %v2418_v14 = vmax.f32 %v2937_v6, 0.0 }
 0x1cf   : > { %v2417_v17 = vmax.f32 %v2906_v9, 0.0  ;;  %v2419_v18 = vmax.f32 %v2938_v10, 0.0 }
 0x1d0   : > { %v2452_v19 = vpack.c.bf16 %v2416_v13, %v2412_v11  ;;  %v2454_v20 = vpack.c.bf16 %v2418_v14, %v2414_v12 }
 0x1d1   : > { %v2453_v21 = vpack.c.bf16 %v2417_v17, %v2413_v15  ;;  %v2455_v22 = vpack.c.bf16 %v2419_v18, %v2415_v16  ;;  %v2016_v23 = vpop.f32.mrb[28].mxu0  ;;  %v2355_v24 = vpop.f32.mrb[28].mxu1 }
 0x1d2   : > { %v2907_v25 = vadd.f32 %v2016_v23, %v4155_v61  ;;  %v2939_v26 = vadd.f32 %v2355_v24, %v4157_v62  ;;  %v2018_v27 = vpop.f32.mrb[29].mxu0  ;;  %v2357_v28 = vpop.f32.mrb[29].mxu1 }
 0x1d3   : > { %v2908_v29 = vadd.f32 %v2018_v27, %v4159_v63  ;;  %v2940_v30 = vadd.f32 %v2357_v28, %v4161_v0  ;;  %v2020_v31 = vpop.f32.mrb[30].mxu0  ;;  %v2359_v32 = vpop.f32.mrb[30].mxu1  ;;  %2494 = vmatprep.subr.bf16.mxu1 %v2453_v21  ;;  %2534 = vmatprep.subr.bf16.mxu0 %v2455_v22 }
 0x1d4   : > { %v2909_v33 = vadd.f32 %v2020_v31, %v4155_v61  ;;  %v2941_v34 = vadd.f32 %v2359_v32, %v4157_v62  ;;  %v2022_v35 = vpop.f32.mrb[31].mxu0  ;;  %v2361_v36 = vpop.f32.mrb[31].mxu1  ;;  %2495 = vmatpush1.bf16.xpose.msra.mxu1 %v2452_v19  ;;  %2535 = vmatpush1.bf16.xpose.msra.mxu0 %v2454_v20  ;;  %v2420_v39 = vmax.f32 %v2907_v25, 0.0  ;;  %v2422_v40 = vmax.f32 %v2939_v26, 0.0 }
 0x1d5   : > { %v2910_v37 = vadd.f32 %v2022_v35, %v4159_v63  ;;  %v2942_v38 = vadd.f32 %v2361_v36, %v4161_v0  ;;  %v2421_v43 = vmax.f32 %v2908_v29, 0.0  ;;  %v2423_v44 = vmax.f32 %v2940_v30, 0.0 }
 0x1d6   : > { %v2424_v41 = vmax.f32 %v2909_v33, 0.0  ;;  %v2426_v42 = vmax.f32 %v2941_v34, 0.0  ;;  %v2873_v63 = vcombine.low %v4138_v48, %v4138_v48  ;;  %v2875_v0 = vcombine.low %v4143_v49, %v4143_v49 }
 0x1d7   : > { %v2425_v45 = vmax.f32 %v2910_v37, 0.0  ;;  %v2427_v46 = vmax.f32 %v2942_v38, 0.0 }
 0x1d8   : > { %v2456_v47 = vpack.c.bf16 %v2424_v41, %v2420_v39  ;;  %v2458_v61 = vpack.c.bf16 %v2426_v42, %v2422_v40 }
 0x1d9   : > { %v2457_v50 = vpack.c.bf16 %v2425_v45, %v2421_v43  ;;  %v2459_v62 = vpack.c.bf16 %v2427_v46, %v2423_v44 }
 0x1db   : > { %2496 = vmatprep.subr.bf16.mxu1 %v2457_v50  ;;  %2536 = vmatprep.subr.bf16.mxu0 %v2459_v62 }
 0x1dc   : > { %2497 = vmatpush1.bf16.xpose.msra.mxu1 %v2456_v47  ;;  %2537 = vmatpush1.bf16.xpose.msra.mxu0 %v2458_v61 }
 0x1e3   : > { %2515 = vmatmul.mubr.bf16.vlgmr.msra.gmra.mrb[32].mxu1 %v2873_v63  ;;  %2555 = vmatmul.mubr.bf16.vlgmr.msra.gmra.mrb[32].mxu0 %v2875_v0 }
 0x2b6   : > { %v2516_v52 = vpop.f32.mrb[32].mxu1  ;;  %v2556_v53 = vpop.f32.mrb[32].mxu0 }
 0x2b7   : > { %v2517_v54 = vadd.f32 %v2516_v52, %v2466_v51  ;;  %v2518_v55 = vpop.f32.mrb[33].mxu1  ;;  %v2558_v56 = vpop.f32.mrb[33].mxu0 }
 0x2b8   : > { %v2519_v57 = vpop.f32.mrb[34].mxu1  ;;  %v2559_v58 = vpop.f32.mrb[34].mxu0 }
 0x2b9   : > { %v2557_v59 = vadd.f32 %v2556_v53, %v2517_v54  ;;  %v2520_v60 = vpop.f32.mrb[35].mxu1  ;;  %v2560_v1 = vpop.f32.mrb[35].mxu0 }
 0x2bb   : > { %2562 = vmax.xlane.f32.xlu0 %v2557_v59 }
 0x348   : > { %v2563_v2 = vpop.xlane.xlu0 %2562 }
 0x349   : > { %v2564_v48 = vsub.f32 %v2557_v59, %v2563_v2 }
 0x34b   : > { %v2565_v3 = vmul.f32 1.442695, %v2564_v48 }
 0x34d   : > { %3448 = vpow2.f32 %v2565_v3 }
 0x357   : > { %v3449_v49 = vpop.eup %3448 }
 0x358   : > { %2567 = vadd.xlane.f32.xlu1 %v3449_v49 }
 0x3e5   : > { %v2568_v4 = vpop.xlane.xlu1 %2567 }
 0x3e6   : > { %3450 = vlog2.f32 %v2568_v4 }
 0x3f0   : > { %v3451_v5 = vpop.eup %3450 }
 0x3f1   : > { %v2570_v6 = vmul.f32 0.6931472, %v3451_v5 }
 0x3f3   : > { %v2571_v7 = vsub.f32 %v2564_v48, %v2570_v6 }
 0x3f5   : > { %2572 = vst [vmem:[%s222_s15] sm:$0xff] %v2571_v7 }
 0x3f6 PF: > { %s15_s18 = sadd.s32 1, %s3458_s18  }
 0x3f7   : > { %p12_p4 = scmp.ge.s32.totalorder %s15_s18, 4  }
 0x3f9   :  { %14 = sbr.rel (!%p12_p4) target bundleno = 1 (0x1), region = 70 }

</bundles_post_ra>
